<compile_context>
chip_gen: v7x
topology: tpu7x:2x2x1
jax: 0.10.0
libtpu: 0.0.40
codegen_flags: <defaults>
</compile_context>

<pallas_src>
import functools

import jax
import jax.numpy as jnp
from jax.experimental import pallas as pl
from jax.experimental.pallas import tpu as pltpu


def _round_up(x, m):
    return ((x + m - 1) // m) * m


def _cdiv(a, b):
    return -(-a // b)


# ---------------------------------------------------------------------------
# Generation-dispatched VMEM budget
# ---------------------------------------------------------------------------
@functools.lru_cache(maxsize=1)
def _vmem_physical_bytes():
    try:
        info = pltpu.get_tpu_info()
        return int(getattr(info, "vmem_capacity_bytes", 64 << 20))
    except Exception:
        return 64 << 20                      # conservative (v7x-sized) fallback


def _vmem_limit_bytes(need_bytes):
    # ~25% headroom for Mosaic scratch / semaphores; never request > 100 MiB.
    budget = min(_vmem_physical_bytes() * 3 // 4, 100 << 20)
    want = int(1.5 * need_bytes) + (8 << 20)
    return max(min(want, budget), 16 << 20)


# ---------------------------------------------------------------------------
# Pallas kernels: tap-matmul conv + folded-BN + ReLU (optionally + fused 1x1)
# ---------------------------------------------------------------------------
def _cbr_kernel(x_ref, w_ref, sb_ref, o_ref, *, n_taps, row_stride, out_rows):
    """x_ref: (in_rows, KIN) bf16, in_rows = out_rows + (n_taps-1)*row_stride
       w_ref: (n_taps, KIN, OC) bf16,  sb_ref: (2, OC) f32 (scale, bias)
       o_ref: (out_rows, OC)."""
    acc = jnp.dot(x_ref[pl.ds(0, out_rows), :], w_ref[0],
                  preferred_element_type=jnp.float32)
    for t in range(1, n_taps):               # static unroll, chained accumulation
        acc = acc + jnp.dot(x_ref[pl.ds(t * row_stride, out_rows), :], w_ref[t],
                            preferred_element_type=jnp.float32)
    y = jnp.maximum(acc * sb_ref[0:1, :] + sb_ref[1:2, :], 0.0)
    o_ref[...] = y.astype(o_ref.dtype)


def _cbr_fused_out_kernel(x_ref, w_ref, sb_ref, w2_ref, sb2_ref, o_ref, *,
                          n_taps, row_stride, out_rows):
    """Same as _cbr_kernel, then a fused 1x1 ConvBNReLU (w2: (OC, OC2))."""
    acc = jnp.dot(x_ref[pl.ds(0, out_rows), :], w_ref[0],
                  preferred_element_type=jnp.float32)
    for t in range(1, n_taps):
        acc = acc + jnp.dot(x_ref[pl.ds(t * row_stride, out_rows), :], w_ref[t],
                            preferred_element_type=jnp.float32)
    y = jnp.maximum(acc * sb_ref[0:1, :] + sb_ref[1:2, :], 0.0)
    y = y.astype(jnp.bfloat16)
    acc2 = jnp.dot(y, w2_ref[...], preferred_element_type=jnp.float32)
    y2 = jnp.maximum(acc2 * sb2_ref[0:1, :] + sb2_ref[1:2, :], 0.0)
    o_ref[...] = y2.astype(o_ref.dtype)


# ---------------------------------------------------------------------------
# One ConvBNReLU layer (optionally with a fused trailing 1x1 ConvBNReLU)
# ---------------------------------------------------------------------------
def conv_bn_relu(x_nhwc, p, *, ks, stride, pad, fold_dh, out_dtype,
                 fuse_out=None, eps=1e-5, target_rows=2048):
    N, H, W, C = x_nhwc.shape
    OC = p["w"].shape[0]
    s = stride
    OH = (H + 2 * pad - ks) // s + 1
    OW = (W + 2 * pad - ks) // s + 1
    Kg = (ks - 1) // s + 1                   # taps per spatial dim after stride absorb
    Cg = s * s * C                           # channels after space-to-depth
    OW_pad = _round_up(OW, 8)                # sublane-aligned super-row width

    # ---- output-row chunking (second grid axis) ----
    TOH = max(1, min(OH, target_rows // OW_pad))
    if N == 1 and OH >= 2:
        TOH = min(TOH, _cdiv(OH, 2))         # >=2 grid steps at batch 1 (megacore)
    n_chunks = _cdiv(OH, TOH)
    OH_pad = n_chunks * TOH
    out_rows = TOH * OW_pad

    # ---- space-to-depth + tap folding (only wrapper-side data shuffle) ----
    R_src = OH_pad + Kg - 1
    W_src = OW_pad + Kg - 1
    Hp, Wp = R_src * s, W_src * s
    xpad = jnp.pad(x_nhwc, ((0, 0),
                            (pad, max(0, Hp - H - pad)),
                            (pad, max(0, Wp - W - pad)),
                            (0, 0)))[:, :Hp, :Wp, :]
    xg = xpad.reshape(N, R_src, s, W_src, s, C)
    xg = xg.transpose(0, 1, 3, 2, 4, 5).reshape(N, R_src, W_src, Cg)
    xg = xg.astype(jnp.bfloat16)

    if fold_dh:
        # Full im2col (cheap: C small) -> contraction Kg*Kg*Cg, single tap.
        parts = [xg[:, dh:dh + OH_pad, dw:dw + OW_pad, :]
                 for dh in range(Kg) for dw in range(Kg)]
        xf = parts[0] if len(parts) == 1 else jnp.concatenate(parts, axis=-1)
        KIN, n_taps = Kg * Kg * Cg, 1
        in_rows = out_rows
        xchunks = xf.reshape(N, n_chunks, in_rows, KIN)
    else:
        # Fold only the width taps -> contraction Kg*Cg, Kg height taps.
        parts = [xg[:, :, dw:dw + OW_pad, :] for dw in range(Kg)]
        xw = parts[0] if len(parts) == 1 else jnp.concatenate(parts, axis=-1)
        KIN, n_taps = Kg * Cg, Kg
        win = TOH + Kg - 1                   # chunk rows + halo (pre-materialised)
        idx = jnp.arange(n_chunks)[:, None] * TOH + jnp.arange(win)[None, :]
        in_rows = win * OW_pad
        xchunks = xw[:, idx].reshape(N, n_chunks, in_rows, KIN)

    # ---- fold weights to (n_taps, KIN, OC); fold BN into (2, OC) ----
    Kp = Kg * s
    wp = jnp.pad(p["w"], ((0, 0), (0, 0), (0, Kp - ks), (0, Kp - ks)))
    wg = wp.reshape(OC, C, Kg, s, Kg, s).transpose(2, 4, 3, 5, 1, 0)  # dh,dw,ph,pw,c,oc
    wfold = wg.reshape(n_taps, KIN, OC).astype(jnp.bfloat16)
    scale = p["gamma"] / jnp.sqrt(p["var"] + eps)
    bias = p["beta"] - p["mean"] * scale
    sb = jnp.stack([scale, bias], axis=0).astype(jnp.float32)

    in_specs = [
        pl.BlockSpec((None, None, in_rows, KIN), lambda n, c: (n, c, 0, 0)),
        pl.BlockSpec((n_taps, KIN, OC), lambda n, c: (0, 0, 0)),
        pl.BlockSpec((2, OC), lambda n, c: (0, 0)),
    ]
    operands = [xchunks, wfold, sb]
    oc_out = OC
    if fuse_out is None:
        kern = functools.partial(_cbr_kernel, n_taps=n_taps,
                                 row_stride=OW_pad, out_rows=out_rows)
    else:
        OC2 = fuse_out["w"].shape[0]
        w2 = fuse_out["w"].reshape(OC2, OC).T.astype(jnp.bfloat16)     # (OC, OC2)
        s2 = fuse_out["gamma"] / jnp.sqrt(fuse_out["var"] + eps)
        b2 = fuse_out["beta"] - fuse_out["mean"] * s2
        sb2 = jnp.stack([s2, b2], axis=0).astype(jnp.float32)
        in_specs += [pl.BlockSpec((OC, OC2), lambda n, c: (0, 0)),
                     pl.BlockSpec((2, OC2), lambda n, c: (0, 0))]
        operands += [w2, sb2]
        oc_out = OC2
        kern = functools.partial(_cbr_fused_out_kernel, n_taps=n_taps,
                                 row_stride=OW_pad, out_rows=out_rows)

    out_itemsize = jnp.dtype(out_dtype).itemsize
    need = (2 * in_rows * KIN * 2                       # double-buffered input
            + 2 * n_taps * KIN * OC * 2 + 2 * OC * 4    # weights + scale/bias
            + 2 * out_rows * oc_out * out_itemsize      # double-buffered output
            + (n_taps + 2) * out_rows * max(OC, oc_out) * 4)   # accum temps
    if fuse_out is not None:
        need += 2 * OC * oc_out * 2 + 2 * oc_out * 4 + out_rows * OC * 2

    out = pl.pallas_call(
        kern,
        out_shape=jax.ShapeDtypeStruct((N, n_chunks, out_rows, oc_out), out_dtype),
        grid_spec=pltpu.PrefetchScalarGridSpec(
            num_scalar_prefetch=0,
            grid=(N, n_chunks),
            in_specs=in_specs,
            out_specs=pl.BlockSpec((None, None, out_rows, oc_out),
                                   lambda n, c: (n, c, 0, 0)),
        ),
        compiler_params=pltpu.CompilerParams(
            dimension_semantics=("parallel", "parallel"),
            vmem_limit_bytes=_vmem_limit_bytes(need),
        ),
    )(*operands)

    out = out.reshape(N, OH_pad, OW_pad, oc_out)[:, :OH, :OW, :]
    return out


# ---------------------------------------------------------------------------
# SpatialPath forward: conv1 -> conv2 -> (conv3 + conv_out fused)
# ---------------------------------------------------------------------------
@jax.jit
def spatial_path(x_nchw, params):
    x = jnp.transpose(x_nchw, (0, 2, 3, 1))             # NCHW -> NHWC
    # conv1: 7x7/s2/p3, C=3 -> full im2col (contraction 192), bf16 activations
    x = conv_bn_relu(x, params["conv1"], ks=7, stride=2, pad=3,
                     fold_dh=True, out_dtype=jnp.bfloat16)
    # conv2: 3x3/s2/p1 -> width taps folded (contraction 512, 2 height taps)
    x = conv_bn_relu(x, params["conv2"], ks=3, stride=2, pad=1,
                     fold_dh=False, out_dtype=jnp.bfloat16)
    # conv3 + conv_out: 3x3/s2/p1 then fused 1x1 (64->128), lane-dense f32 out
    x = conv_bn_relu(x, params["conv3"], ks=3, stride=2, pad=1,
                     fold_dh=False, out_dtype=jnp.float32,
                     fuse_out=params["conv_out"])
    return jnp.transpose(x, (0, 3, 1, 2))               # NHWC -> NCHW


# ---------------------------------------------------------------------------
# Parameters (kaiming_normal_(a=1) conv weights; BatchNorm2d defaults)
# ---------------------------------------------------------------------------
def _make_convbnrelu_params(key, in_chan, out_chan, ks):
    fan_in = in_chan * ks * ks
    std = (2.0 / ((1.0 + 1.0 ** 2) * fan_in)) ** 0.5     # kaiming_normal_, a=1
    w = std * jax.random.normal(key, (out_chan, in_chan, ks, ks),
                                dtype=jnp.float32)
    return dict(
        w=w,
        gamma=jnp.ones((out_chan,), jnp.float32),
        beta=jnp.zeros((out_chan,), jnp.float32),
        mean=jnp.zeros((out_chan,), jnp.float32),
        var=jnp.ones((out_chan,), jnp.float32),
    )


def make_spatial_path_params(key):
    k1, k2, k3, k4 = jax.random.split(key, 4)
    return {
        "conv1": _make_convbnrelu_params(k1, 3, 64, 7),
        "conv2": _make_convbnrelu_params(k2, 64, 64, 3),
        "conv3": _make_convbnrelu_params(k3, 64, 64, 3),
        "conv_out": _make_convbnrelu_params(k4, 64, 128, 1),
    }


# ---------------------------------------------------------------------------
# Reference (lax conv) mirroring the kernel's bf16-operand / f32-accum path
# ---------------------------------------------------------------------------
_REF_CFG = (("conv1", 2, 3), ("conv2", 2, 1), ("conv3", 2, 1), ("conv_out", 1, 0))


def _ref_layer(x_nhwc, p, stride, pad, eps=1e-5):
    xb = x_nhwc.astype(jnp.bfloat16).astype(jnp.float32)
    wb = p["w"].astype(jnp.bfloat16).astype(jnp.float32)
    w_hwio = jnp.transpose(wb, (2, 3, 1, 0))
    out = jax.lax.conv_general_dilated(
        xb, w_hwio, window_strides=(stride, stride),
        padding=[(pad, pad), (pad, pad)],
        dimension_numbers=("NHWC", "HWIO", "NHWC"))
    s = p["gamma"] / jnp.sqrt(p["var"] + eps)
    return jnp.maximum(out * s + (p["beta"] - p["mean"] * s), 0.0)


def spatial_path_ref(x_nchw, params):
    x = jnp.transpose(x_nchw, (0, 2, 3, 1))
    for name, stride, pad in _REF_CFG:
        x = _ref_layer(x, params[name], stride, pad)
    return jnp.transpose(x, (0, 3, 1, 2))


if __name__ == "__main__":
    key = jax.random.PRNGKey(0)
    kx1, kx2, kp = jax.random.split(key, 3)
    params = make_spatial_path_params(kp)

    # Test 1: small shapes implied by the module (N=2, RGB, 16x16).
    x1 = jax.random.normal(kx1, (2, 3, 16, 16), dtype=jnp.float32)
    out1 = jax.block_until_ready(spatial_path(x1, params))
    assert out1.shape == (2, 128, 2, 2), out1.shape
    ref1 = spatial_path_ref(x1, params)
    assert jnp.allclose(out1, ref1, atol=2e-2, rtol=2e-2), \
        float(jnp.max(jnp.abs(out1 - ref1)))

    # Test 2: larger spatial extent, batch 1 -> exercises the multi-chunk grid.
    x2 = jax.random.normal(kx2, (1, 3, 64, 64), dtype=jnp.float32)
    out2 = jax.block_until_ready(spatial_path(x2, params))
    assert out2.shape == (1, 128, 8, 8), out2.shape
    ref2 = spatial_path_ref(x2, params)
    assert jnp.allclose(out2, ref2, atol=2e-2, rtol=2e-2), \
        float(jnp.max(jnp.abs(out2 - ref2)))

    print("KERNEL_OK")
</pallas_src>

<mosaic_0001>
module attributes {stable_mosaic.version = 11 : i64} {
  func.func @_cbr_kernel(%arg0: i32, %arg1: i32, %arg2: memref<1x1x64x192xbf16, #tpu.memory_space<vmem>>, %arg3: memref<1x192x64xbf16, #tpu.memory_space<vmem>>, %arg4: memref<2x64xf32, #tpu.memory_space<vmem>>, %arg5: memref<1x1x64x64xbf16, #tpu.memory_space<vmem>>) attributes {dimension_semantics = [#tpu.dimension_semantics<parallel>, #tpu.dimension_semantics<parallel>], iteration_bounds = array<i64: 2, 1>, scalar_prefetch = 0 : i64, scratch_operands = 0 : i64, tpu.core_type = #tpu.core_type<tc>, window_params = [{transform_indices = @transform_0, window_bounds = array<i64: 1, 1, 64, 192>}, {pipeline_mode = #tpu.pipeline_mode<synchronous>, transform_indices = @transform_1, window_bounds = array<i64: 1, 192, 64>}, {pipeline_mode = #tpu.pipeline_mode<synchronous>, transform_indices = @transform_2, window_bounds = array<i64: 2, 64>}, {transform_indices = @transform_3, window_bounds = array<i64: 1, 1, 64, 64>}]} {
    %c0 = arith.constant 0 : index
    %c0_0 = arith.constant 0 : index
    %c0_1 = arith.constant 0 : index
    %c0_2 = arith.constant 0 : index
    %0 = vector.load %arg2[%c0, %c0_0, %c0_1, %c0_2] : memref<1x1x64x192xbf16, #tpu.memory_space<vmem>>, vector<1x1x64x192xbf16>
    %1 = vector.shape_cast %0 : vector<1x1x64x192xbf16> to vector<64x192xbf16>
    %c0_3 = arith.constant 0 : index
    %c0_4 = arith.constant 0 : index
    %c0_5 = arith.constant 0 : index
    %2 = vector.load %arg3[%c0_3, %c0_4, %c0_5] : memref<1x192x64xbf16, #tpu.memory_space<vmem>>, vector<1x192x64xbf16>
    %3 = vector.shape_cast %2 : vector<1x192x64xbf16> to vector<192x64xbf16>
    %cst = arith.constant dense<0.000000e+00> : vector<64x64xf32>
    %4 = tpu.matmul %1, %3, %cst {dimension_numbers = #tpu.dot_dimension_numbers<[1], [0], [0], [1], [0, 0, 1, 1], [], []>} : vector<64x192xbf16>, vector<192x64xbf16>, vector<64x64xf32> -> vector<64x64xf32>
    %c0_6 = arith.constant 0 : index
    %c0_7 = arith.constant 0 : index
    %5 = vector.load %arg4[%c0_6, %c0_7] : memref<2x64xf32, #tpu.memory_space<vmem>>, vector<1x64xf32>
    %6 = vector.broadcast %5 : vector<1x64xf32> to vector<64x64xf32>
    %7 = arith.mulf %4, %6 : vector<64x64xf32>
    %c1 = arith.constant 1 : index
    %c0_8 = arith.constant 0 : index
    %8 = vector.load %arg4[%c1, %c0_8] : memref<2x64xf32, #tpu.memory_space<vmem>>, vector<1x64xf32>
    %9 = vector.broadcast %8 : vector<1x64xf32> to vector<64x64xf32>
    %10 = arith.addf %7, %9 : vector<64x64xf32>
    %cst_9 = arith.constant 0.000000e+00 : f32
    %11 = vector.broadcast %cst_9 : f32 to vector<64x64xf32>
    %12 = arith.maximumf %10, %11 : vector<64x64xf32>
    %13 = arith.truncf %12 : vector<64x64xf32> to vector<64x64xbf16>
    %c0_10 = arith.constant 0 : index
    %c0_11 = arith.constant 0 : index
    %c0_12 = arith.constant 0 : index
    %c0_13 = arith.constant 0 : index
    %14 = vector.load %arg5[%c0_10, %c0_11, %c0_12, %c0_13] : memref<1x1x64x64xbf16, #tpu.memory_space<vmem>>, vector<1x1x64x64xbf16>
    %15 = vector.shape_cast %14 : vector<1x1x64x64xbf16> to vector<64x64xbf16>
    %16 = vector.shape_cast %13 : vector<64x64xbf16> to vector<1x1x64x64xbf16>
    tpu.vector_store %arg5[%c0_10, %c0_11, %c0_12, %c0_13], %16 {strides = array<i32>} : memref<1x1x64x64xbf16, #tpu.memory_space<vmem>>, vector<1x1x64x64xbf16>,
    return
  }
  func.func @transform_0(%arg0: i32, %arg1: i32) -> (i32, i32, i32, i32) {
    %c0_i32 = arith.constant 0 : i32
    %c0_i32_0 = arith.constant 0 : i32
    %c0_i32_1 = arith.constant 0 : i32
    return %arg0, %arg1, %c0_i32, %c0_i32_0 : i32, i32, i32, i32
  }
  func.func @transform_1(%arg0: i32, %arg1: i32) -> (i32, i32, i32) {
    %c0_i32 = arith.constant 0 : i32
    %c0_i32_0 = arith.constant 0 : i32
    %c0_i32_1 = arith.constant 0 : i32
    %c0_i32_2 = arith.constant 0 : i32
    return %c0_i32, %c0_i32_0, %c0_i32_1 : i32, i32, i32
  }
  func.func @transform_2(%arg0: i32, %arg1: i32) -> (i32, i32) {
    %c0_i32 = arith.constant 0 : i32
    %c0_i32_0 = arith.constant 0 : i32
    %c0_i32_1 = arith.constant 0 : i32
    return %c0_i32, %c0_i32_0 : i32, i32
  }
  func.func @transform_3(%arg0: i32, %arg1: i32) -> (i32, i32, i32, i32) {
    %c0_i32 = arith.constant 0 : i32
    %c0_i32_0 = arith.constant 0 : i32
    %c0_i32_1 = arith.constant 0 : i32
    return %arg0, %arg1, %c0_i32, %c0_i32_0 : i32, i32, i32, i32
  }
}

module attributes {stable_mosaic.version = 11 : i64} {
  func.func @_cbr_kernel(%arg0: i32, %arg1: i32, %arg2: memref<1x1x40x512xbf16, #tpu.memory_space<vmem>>, %arg3: memref<2x512x64xbf16, #tpu.memory_space<vmem>>, %arg4: memref<2x64xf32, #tpu.memory_space<vmem>>, %arg5: memref<1x1x32x64xbf16, #tpu.memory_space<vmem>>) attributes {dimension_semantics = [#tpu.dimension_semantics<parallel>, #tpu.dimension_semantics<parallel>], iteration_bounds = array<i64: 2, 1>, scalar_prefetch = 0 : i64, scratch_operands = 0 : i64, tpu.core_type = #tpu.core_type<tc>, window_params = [{transform_indices = @transform_0, window_bounds = array<i64: 1, 1, 40, 512>}, {pipeline_mode = #tpu.pipeline_mode<synchronous>, transform_indices = @transform_1, window_bounds = array<i64: 2, 512, 64>}, {pipeline_mode = #tpu.pipeline_mode<synchronous>, transform_indices = @transform_2, window_bounds = array<i64: 2, 64>}, {transform_indices = @transform_3, window_bounds = array<i64: 1, 1, 32, 64>}]} {
    %c0 = arith.constant 0 : index
    %c0_0 = arith.constant 0 : index
    %c0_1 = arith.constant 0 : index
    %c0_2 = arith.constant 0 : index
    %0 = vector.load %arg2[%c0, %c0_0, %c0_1, %c0_2] : memref<1x1x40x512xbf16, #tpu.memory_space<vmem>>, vector<1x1x32x512xbf16>
    %1 = vector.shape_cast %0 : vector<1x1x32x512xbf16> to vector<32x512xbf16>
    %c0_3 = arith.constant 0 : index
    %c0_4 = arith.constant 0 : index
    %c0_5 = arith.constant 0 : index
    %2 = vector.load %arg3[%c0_3, %c0_4, %c0_5] : memref<2x512x64xbf16, #tpu.memory_space<vmem>>, vector<1x512x64xbf16>
    %3 = vector.shape_cast %2 : vector<1x512x64xbf16> to vector<512x64xbf16>
    %cst = arith.constant dense<0.000000e+00> : vector<32x64xf32>
    %4 = tpu.matmul %1, %3, %cst {dimension_numbers = #tpu.dot_dimension_numbers<[1], [0], [0], [1], [0, 0, 1, 1], [], []>} : vector<32x512xbf16>, vector<512x64xbf16>, vector<32x64xf32> -> vector<32x64xf32>
    %c0_6 = arith.constant 0 : index
    %c0_7 = arith.constant 0 : index
    %c8 = arith.constant 8 : index
    %c0_8 = arith.constant 0 : index
    %5 = vector.load %arg2[%c0_6, %c0_7, %c8, %c0_8] : memref<1x1x40x512xbf16, #tpu.memory_space<vmem>>, vector<1x1x32x512xbf16>
    %6 = vector.shape_cast %5 : vector<1x1x32x512xbf16> to vector<32x512xbf16>
    %c1 = arith.constant 1 : index
    %c0_9 = arith.constant 0 : index
    %c0_10 = arith.constant 0 : index
    %7 = vector.load %arg3[%c1, %c0_9, %c0_10] : memref<2x512x64xbf16, #tpu.memory_space<vmem>>, vector<1x512x64xbf16>
    %8 = vector.shape_cast %7 : vector<1x512x64xbf16> to vector<512x64xbf16>
    %cst_11 = arith.constant dense<0.000000e+00> : vector<32x64xf32>
    %9 = tpu.matmul %6, %8, %cst_11 {dimension_numbers = #tpu.dot_dimension_numbers<[1], [0], [0], [1], [0, 0, 1, 1], [], []>} : vector<32x512xbf16>, vector<512x64xbf16>, vector<32x64xf32> -> vector<32x64xf32>
    %10 = arith.addf %4, %9 : vector<32x64xf32>
    %c0_12 = arith.constant 0 : index
    %c0_13 = arith.constant 0 : index
    %11 = vector.load %arg4[%c0_12, %c0_13] : memref<2x64xf32, #tpu.memory_space<vmem>>, vector<1x64xf32>
    %12 = vector.broadcast %11 : vector<1x64xf32> to vector<32x64xf32>
    %13 = arith.mulf %10, %12 : vector<32x64xf32>
    %c1_14 = arith.constant 1 : index
    %c0_15 = arith.constant 0 : index
    %14 = vector.load %arg4[%c1_14, %c0_15] : memref<2x64xf32, #tpu.memory_space<vmem>>, vector<1x64xf32>
    %15 = vector.broadcast %14 : vector<1x64xf32> to vector<32x64xf32>
    %16 = arith.addf %13, %15 : vector<32x64xf32>
    %cst_16 = arith.constant 0.000000e+00 : f32
    %17 = vector.broadcast %cst_16 : f32 to vector<32x64xf32>
    %18 = arith.maximumf %16, %17 : vector<32x64xf32>
    %19 = arith.truncf %18 : vector<32x64xf32> to vector<32x64xbf16>
    %c0_17 = arith.constant 0 : index
    %c0_18 = arith.constant 0 : index
    %c0_19 = arith.constant 0 : index
    %c0_20 = arith.constant 0 : index
    %20 = vector.load %arg5[%c0_17, %c0_18, %c0_19, %c0_20] : memref<1x1x32x64xbf16, #tpu.memory_space<vmem>>, vector<1x1x32x64xbf16>
    %21 = vector.shape_cast %20 : vector<1x1x32x64xbf16> to vector<32x64xbf16>
    %22 = vector.shape_cast %19 : vector<32x64xbf16> to vector<1x1x32x64xbf16>
    tpu.vector_store %arg5[%c0_17, %c0_18, %c0_19, %c0_20], %22 {strides = array<i32>} : memref<1x1x32x64xbf16, #tpu.memory_space<vmem>>, vector<1x1x32x64xbf16>,
    return
  }
  func.func @transform_0(%arg0: i32, %arg1: i32) -> (i32, i32, i32, i32) {
    %c0_i32 = arith.constant 0 : i32
    %c0_i32_0 = arith.constant 0 : i32
    %c0_i32_1 = arith.constant 0 : i32
    return %arg0, %arg1, %c0_i32, %c0_i32_0 : i32, i32, i32, i32
  }
  func.func @transform_1(%arg0: i32, %arg1: i32) -> (i32, i32, i32) {
    %c0_i32 = arith.constant 0 : i32
    %c0_i32_0 = arith.constant 0 : i32
    %c0_i32_1 = arith.constant 0 : i32
    %c0_i32_2 = arith.constant 0 : i32
    return %c0_i32, %c0_i32_0, %c0_i32_1 : i32, i32, i32
  }
  func.func @transform_2(%arg0: i32, %arg1: i32) -> (i32, i32) {
    %c0_i32 = arith.constant 0 : i32
    %c0_i32_0 = arith.constant 0 : i32
    %c0_i32_1 = arith.constant 0 : i32
    return %c0_i32, %c0_i32_0 : i32, i32
  }
  func.func @transform_3(%arg0: i32, %arg1: i32) -> (i32, i32, i32, i32) {
    %c0_i32 = arith.constant 0 : i32
    %c0_i32_0 = arith.constant 0 : i32
    %c0_i32_1 = arith.constant 0 : i32
    return %arg0, %arg1, %c0_i32, %c0_i32_0 : i32, i32, i32, i32
  }
}

module attributes {stable_mosaic.version = 11 : i64} {
  func.func @_cbr_fused_out_kernel(%arg0: i32, %arg1: i32, %arg2: memref<1x1x24x512xbf16, #tpu.memory_space<vmem>>, %arg3: memref<2x512x64xbf16, #tpu.memory_space<vmem>>, %arg4: memref<2x64xf32, #tpu.memory_space<vmem>>, %arg5: memref<64x128xbf16, #tpu.memory_space<vmem>>, %arg6: memref<2x128xf32, #tpu.memory_space<vmem>>, %arg7: memref<1x1x16x128xf32, #tpu.memory_space<vmem>>) attributes {dimension_semantics = [#tpu.dimension_semantics<parallel>, #tpu.dimension_semantics<parallel>], iteration_bounds = array<i64: 2, 1>, scalar_prefetch = 0 : i64, scratch_operands = 0 : i64, tpu.core_type = #tpu.core_type<tc>, window_params = [{transform_indices = @transform_0, window_bounds = array<i64: 1, 1, 24, 512>}, {pipeline_mode = #tpu.pipeline_mode<synchronous>, transform_indices = @transform_1, window_bounds = array<i64: 2, 512, 64>}, {pipeline_mode = #tpu.pipeline_mode<synchronous>, transform_indices = @transform_2, window_bounds = array<i64: 2, 64>}, {pipeline_mode = #tpu.pipeline_mode<synchronous>, transform_indices = @transform_3, window_bounds = array<i64: 64, 128>}, {pipeline_mode = #tpu.pipeline_mode<synchronous>, transform_indices = @transform_4, window_bounds = array<i64: 2, 128>}, {transform_indices = @transform_5, window_bounds = array<i64: 1, 1, 16, 128>}]} {
    %c0 = arith.constant 0 : index
    %c0_0 = arith.constant 0 : index
    %c0_1 = arith.constant 0 : index
    %c0_2 = arith.constant 0 : index
    %0 = vector.load %arg2[%c0, %c0_0, %c0_1, %c0_2] : memref<1x1x24x512xbf16, #tpu.memory_space<vmem>>, vector<1x1x16x512xbf16>
    %1 = vector.shape_cast %0 : vector<1x1x16x512xbf16> to vector<16x512xbf16>
    %c0_3 = arith.constant 0 : index
    %c0_4 = arith.constant 0 : index
    %c0_5 = arith.constant 0 : index
    %2 = vector.load %arg3[%c0_3, %c0_4, %c0_5] : memref<2x512x64xbf16, #tpu.memory_space<vmem>>, vector<1x512x64xbf16>
    %3 = vector.shape_cast %2 : vector<1x512x64xbf16> to vector<512x64xbf16>
    %cst = arith.constant dense<0.000000e+00> : vector<16x64xf32>
    %4 = tpu.matmul %1, %3, %cst {dimension_numbers = #tpu.dot_dimension_numbers<[1], [0], [0], [1], [0, 0, 1, 1], [], []>} : vector<16x512xbf16>, vector<512x64xbf16>, vector<16x64xf32> -> vector<16x64xf32>
    %c0_6 = arith.constant 0 : index
    %c0_7 = arith.constant 0 : index
    %c8 = arith.constant 8 : index
    %c0_8 = arith.constant 0 : index
    %5 = vector.load %arg2[%c0_6, %c0_7, %c8, %c0_8] : memref<1x1x24x512xbf16, #tpu.memory_space<vmem>>, vector<1x1x16x512xbf16>
    %6 = vector.shape_cast %5 : vector<1x1x16x512xbf16> to vector<16x512xbf16>
    %c1 = arith.constant 1 : index
    %c0_9 = arith.constant 0 : index
    %c0_10 = arith.constant 0 : index
    %7 = vector.load %arg3[%c1, %c0_9, %c0_10] : memref<2x512x64xbf16, #tpu.memory_space<vmem>>, vector<1x512x64xbf16>
    %8 = vector.shape_cast %7 : vector<1x512x64xbf16> to vector<512x64xbf16>
    %cst_11 = arith.constant dense<0.000000e+00> : vector<16x64xf32>
    %9 = tpu.matmul %6, %8, %cst_11 {dimension_numbers = #tpu.dot_dimension_numbers<[1], [0], [0], [1], [0, 0, 1, 1], [], []>} : vector<16x512xbf16>, vector<512x64xbf16>, vector<16x64xf32> -> vector<16x64xf32>
    %10 = arith.addf %4, %9 : vector<16x64xf32>
    %c0_12 = arith.constant 0 : index
    %c0_13 = arith.constant 0 : index
    %11 = vector.load %arg4[%c0_12, %c0_13] : memref<2x64xf32, #tpu.memory_space<vmem>>, vector<1x64xf32>
    %12 = vector.broadcast %11 : vector<1x64xf32> to vector<16x64xf32>
    %13 = arith.mulf %10, %12 : vector<16x64xf32>
    %c1_14 = arith.constant 1 : index
    %c0_15 = arith.constant 0 : index
    %14 = vector.load %arg4[%c1_14, %c0_15] : memref<2x64xf32, #tpu.memory_space<vmem>>, vector<1x64xf32>
    %15 = vector.broadcast %14 : vector<1x64xf32> to vector<16x64xf32>
    %16 = arith.addf %13, %15 : vector<16x64xf32>
    %cst_16 = arith.constant 0.000000e+00 : f32
    %17 = vector.broadcast %cst_16 : f32 to vector<16x64xf32>
    %18 = arith.maximumf %16, %17 : vector<16x64xf32>
    %19 = arith.truncf %18 : vector<16x64xf32> to vector<16x64xbf16>
    %c0_17 = arith.constant 0 : index
    %c0_18 = arith.constant 0 : index
    %20 = vector.load %arg5[%c0_17, %c0_18] : memref<64x128xbf16, #tpu.memory_space<vmem>>, vector<64x128xbf16>
    %cst_19 = arith.constant dense<0.000000e+00> : vector<16x128xf32>
    %21 = tpu.matmul %19, %20, %cst_19 {dimension_numbers = #tpu.dot_dimension_numbers<[1], [0], [0], [1], [0, 0, 1, 1], [], []>} : vector<16x64xbf16>, vector<64x128xbf16>, vector<16x128xf32> -> vector<16x128xf32>
    %c0_20 = arith.constant 0 : index
    %c0_21 = arith.constant 0 : index
    %22 = vector.load %arg6[%c0_20, %c0_21] : memref<2x128xf32, #tpu.memory_space<vmem>>, vector<1x128xf32>
    %23 = vector.broadcast %22 : vector<1x128xf32> to vector<16x128xf32>
    %24 = arith.mulf %21, %23 : vector<16x128xf32>
    %c1_22 = arith.constant 1 : index
    %c0_23 = arith.constant 0 : index
    %25 = vector.load %arg6[%c1_22, %c0_23] : memref<2x128xf32, #tpu.memory_space<vmem>>, vector<1x128xf32>
    %26 = vector.broadcast %25 : vector<1x128xf32> to vector<16x128xf32>
    %27 = arith.addf %24, %26 : vector<16x128xf32>
    %cst_24 = arith.constant 0.000000e+00 : f32
    %28 = vector.broadcast %cst_24 : f32 to vector<16x128xf32>
    %29 = arith.maximumf %27, %28 : vector<16x128xf32>
    %c0_25 = arith.constant 0 : index
    %c0_26 = arith.constant 0 : index
    %c0_27 = arith.constant 0 : index
    %c0_28 = arith.constant 0 : index
    %30 = vector.load %arg7[%c0_25, %c0_26, %c0_27, %c0_28] : memref<1x1x16x128xf32, #tpu.memory_space<vmem>>, vector<1x1x16x128xf32>
    %31 = vector.shape_cast %30 : vector<1x1x16x128xf32> to vector<16x128xf32>
    %32 = vector.shape_cast %29 : vector<16x128xf32> to vector<1x1x16x128xf32>
    tpu.vector_store %arg7[%c0_25, %c0_26, %c0_27, %c0_28], %32 {strides = array<i32>} : memref<1x1x16x128xf32, #tpu.memory_space<vmem>>, vector<1x1x16x128xf32>,
    return
  }
  func.func @transform_0(%arg0: i32, %arg1: i32) -> (i32, i32, i32, i32) {
    %c0_i32 = arith.constant 0 : i32
    %c0_i32_0 = arith.constant 0 : i32
    %c0_i32_1 = arith.constant 0 : i32
    return %arg0, %arg1, %c0_i32, %c0_i32_0 : i32, i32, i32, i32
  }
  func.func @transform_1(%arg0: i32, %arg1: i32) -> (i32, i32, i32) {
    %c0_i32 = arith.constant 0 : i32
    %c0_i32_0 = arith.constant 0 : i32
    %c0_i32_1 = arith.constant 0 : i32
    %c0_i32_2 = arith.constant 0 : i32
    return %c0_i32, %c0_i32_0, %c0_i32_1 : i32, i32, i32
  }
  func.func @transform_2(%arg0: i32, %arg1: i32) -> (i32, i32) {
    %c0_i32 = arith.constant 0 : i32
    %c0_i32_0 = arith.constant 0 : i32
    %c0_i32_1 = arith.constant 0 : i32
    return %c0_i32, %c0_i32_0 : i32, i32
  }
  func.func @transform_3(%arg0: i32, %arg1: i32) -> (i32, i32) {
    %c0_i32 = arith.constant 0 : i32
    %c0_i32_0 = arith.constant 0 : i32
    %c0_i32_1 = arith.constant 0 : i32
    return %c0_i32, %c0_i32_0 : i32, i32
  }
  func.func @transform_4(%arg0: i32, %arg1: i32) -> (i32, i32) {
    %c0_i32 = arith.constant 0 : i32
    %c0_i32_0 = arith.constant 0 : i32
    %c0_i32_1 = arith.constant 0 : i32
    return %c0_i32, %c0_i32_0 : i32, i32
  }
  func.func @transform_5(%arg0: i32, %arg1: i32) -> (i32, i32, i32, i32) {
    %c0_i32 = arith.constant 0 : i32
    %c0_i32_0 = arith.constant 0 : i32
    %c0_i32_1 = arith.constant 0 : i32
    return %arg0, %arg1, %c0_i32, %c0_i32_0 : i32, i32, i32, i32
  }
}

</mosaic_0001>

<bundles_post_ra>
// kernel: spatial_path.3
= control target key start
LH: loop header
LB: loop body
LE: loop exit
PB: predicated region body
PF: predicated region fallthrough
CT: control target
= control target key end

     0   :  { %s766_s12 = smov 0   ;;  %s768_s13 = smov 0   ;;  %s901_s0 = inlined_call_operand.vmem [shape: bf16[2,1,64,192], index: 0, kind: input, shape index: {}]   ;;  %s902_s1 = inlined_call_operand.vmem [shape: bf16[1,192,64], index: 1, kind: input, shape index: {}]   ;;  %s903_s2 = inlined_call_operand.vmem [shape: f32[2,64], index: 2, kind: input, shape index: {}]   ;;  %s904_s3 = inlined_call_operand.vmem [shape: bf16[2,1,64,64], index: 3, kind: output, shape index: {}]  }
   0x1   :  { %s770_s14 = smov 0  }
   0x2 LB: > { %s25_s15 = sadd.s32 1, %s739_s13  ;;  %p597_p0 = scmp.ge.s32.totalorder %s743_s14, 1  ;;  %s743_s14 = sphi %s770_s14, %s13_s14   ;;  %s739_s13 = sphi %s768_s13, %s906_s13   ;;  %s735_s12 = sphi %s766_s12, %s905_s12  }
   0x3   : > { %p27_p1 = scmp.ge.s32.totalorder %s25_s15, 2  ;;  %p157_p2 = scmp.lt.s32.totalorder %s743_s14, 3 }
   0x5   : > { %s908_s15 = smov (%p27_p1, %s25_s15), 0  ;;  %p158_p3 = pnand %p597_p0, %p157_p2 }
   0x6   : > { %v697_v0 = vld [vmem:[%s902_s1] sm:$0xff] (!%p158_p3)   ;;  %v745_v1 = vmov (!%p158_p3), 0   ;;  %p189_p4 = scmp.lt.s32.totalorder (!%p158_p3), %s735_s12, 1  ;;  %v698_v2 = vld [vmem:[%s902_s1 + $0x8] sm:$0xff] (!%p158_p3)   ;;  %v699_v3 = vld [vmem:[%s902_s1 + $0x10] sm:$0xff] (!%p158_p3)   ;;  %vm348_vm0 = vcmask (!%p158_p3), 523264  }
   0x7   : > { %161 = sbr.rel (%p158_p3) target bundleno = 286 (0x11e), region = 32  ;;  %361 = vmatprep.subr.bf16.mxu0 (!%p158_p3), %v745_v1  ;;  %648 = vmatprep.subr.bf16.mxu1 (!%p158_p3), %v745_v1  ;;  %v700_v4 = vld [vmem:[%s902_s1 + $0x18] sm:$0xff] (!%p158_p3)   ;;  %v701_v6 = vld [vmem:[%s902_s1 + $0x20] sm:$0xff] (!%p158_p3)   ;;  %v702_v8 = vld [vmem:[%s902_s1 + $0x28] sm:$0xff] (!%p158_p3)   ;;  %vm492_vm1 = vcmask (!%p158_p3), 519168  }
   0x8   : > { %362 = vmatpush1.bf16.msra.mxu0 (!%p158_p3), %v697_v0  ;;  %660 = vmatpush1.bf16.msra.mxu1 (!%p158_p3), %v697_v0  ;;  %v703_v9 = vld [vmem:[%s902_s1 + $0x30] sm:$0xff] (!%p158_p3)   ;;  %v704_v10 = vld [vmem:[%s902_s1 + $0x38] sm:$0xff] (!%p158_p3)   ;;  %v705_v11 = vld [vmem:[%s902_s1 + $0x40] sm:$0xff] (!%p158_p3)  }
   0x9   : > { %363 = vmatprep.subr.bf16.mxu0 (!%p158_p3), %v745_v1  ;;  %649 = vmatprep.subr.bf16.mxu1 (!%p158_p3), %v745_v1  ;;  %v706_v12 = vld [vmem:[%s902_s1 + $0x48] sm:$0xff] (!%p158_p3)   ;;  %v707_v13 = vld [vmem:[%s902_s1 + $0x50] sm:$0xff] (!%p158_p3)   ;;  %v708_v14 = vld [vmem:[%s902_s1 + $0x58] sm:$0xff] (!%p158_p3)  }
   0xa   : > { %v626_v21 = vld [vmem:[%s903_s2] ss:$0 sm:$0xff] (!%p158_p3)  ;;  %v627_v23 = vld [vmem:[%s903_s2 + $0x1] ss:$0 sm:$0xff] (!%p158_p3) }
   0xc   : > { %364 = vmatpush1.bf16.msra.mxu0 (!%p158_p3), %v698_v2  ;;  %661 = vmatpush1.bf16.msra.mxu1 (!%p158_p3), %v698_v2 }
   0xd   : > { %365 = vmatprep.subr.bf16.mxu0 (!%p158_p3), %v745_v1  ;;  %650 = vmatprep.subr.bf16.mxu1 (!%p158_p3), %v745_v1 }
   0xe   : > { %s910_s12 = smov (!%p189_p4, %s735_s12), 1 }
   0xf   : > { %s638_s22 = sshll.u32 %s910_s12, 6  ;;  %s639_s25 = sshll.u32 %s910_s12, 5 }
  0x10   : > { %366 = vmatpush1.bf16.msra.mxu0 %v699_v3  ;;  %662 = vmatpush1.bf16.msra.mxu1 %v699_v3  ;;  %s808_s27 = scalar_lea.vmem %s901_s0, %s638_s22  ;;  %s874_s28 = scalar_lea.vmem %s904_s3, %s639_s25 }
  0x11   : > { %367 = vmatprep.subr.bf16.mxu0 %v745_v1  ;;  %651 = vmatprep.subr.bf16.mxu1 %v745_v1  ;;  %v711_v5 = vld [vmem:[%s808_s27 + $0x4] ss:$8 sps:$4 sm:$0xff]   ;;  %v709_v15 = vld [vmem:[%s808_s27] ss:$8 sps:$4 sm:$0xff]   ;;  %v715_v17 = vld [vmem:[%s808_s27 + $0x14] ss:$8 sps:$4 sm:$0xff]  }
  0x12   : > { %v714_v7 = vld [vmem:[%s808_s27 + $0x24] ss:$8 sps:$4 sm:$0xff]   ;;  %622 = vmatprep.mubr.msk.bf16.mxu0 %vm348_vm0, %v711_v5  ;;  %v712_v16 = vld [vmem:[%s808_s27 + $0x20] ss:$8 sps:$4 sm:$0xff]   ;;  %v717_v18 = vld [vmem:[%s808_s27 + $0x34] ss:$8 sps:$4 sm:$0xff]  }
  0x13   : > { %624 = vmatprep.mubr.msk.bf16.mxu1 %vm348_vm0, %v714_v7  ;;  %v719_v19 = vld [vmem:[%s808_s27 + $0x10] ss:$8 sps:$4 sm:$0xff]  }
  0x14   : > { %368 = vmatpush1.bf16.msra.mxu0 %v700_v4  ;;  %663 = vmatpush1.bf16.msra.mxu1 %v700_v4  ;;  %v720_v20 = vld [vmem:[%s808_s27 + $0x30] ss:$8 sps:$4 sm:$0xff]  }
  0x15   : > { %369 = vmatprep.subr.bf16.mxu0 %v745_v1  ;;  %652 = vmatprep.subr.bf16.mxu1 %v745_v1 }
  0x18   : > { %370 = vmatpush1.bf16.msra.mxu0 %v701_v6  ;;  %664 = vmatpush1.bf16.msra.mxu1 %v701_v6 }
  0x19   : > { %371 = vmatprep.subr.bf16.mxu0 %v745_v1  ;;  %653 = vmatprep.subr.bf16.mxu1 %v745_v1 }
  0x1c   : > { %372 = vmatpush1.bf16.msra.mxu0 %v702_v8  ;;  %665 = vmatpush1.bf16.msra.mxu1 %v702_v8 }
  0x1d   : > { %373 = vmatprep.subr.bf16.mxu0 %v745_v1  ;;  %654 = vmatprep.subr.bf16.mxu1 %v745_v1 }
  0x20   : > { %374 = vmatpush1.bf16.msra.mxu0 %v703_v9  ;;  %666 = vmatpush1.bf16.msra.mxu1 %v703_v9 }
  0x21   : > { %375 = vmatprep.subr.bf16.mxu0 %v745_v1  ;;  %655 = vmatprep.subr.bf16.mxu1 %v745_v1 }
  0x24   : > { %376 = vmatpush1.bf16.msra.mxu0 %v704_v10  ;;  %667 = vmatpush1.bf16.msra.mxu1 %v704_v10 }
  0x25   : > { %377 = vmatprep.subr.bf16.mxu0 %v745_v1  ;;  %656 = vmatprep.subr.bf16.mxu1 %v745_v1 }
  0x28   : > { %378 = vmatpush1.bf16.msra.mxu0 %v705_v11  ;;  %668 = vmatpush1.bf16.msra.mxu1 %v705_v11 }
  0x29   : > { %379 = vmatprep.subr.bf16.mxu0 %v745_v1  ;;  %657 = vmatprep.subr.bf16.mxu1 %v745_v1 }
  0x2c   : > { %380 = vmatpush1.bf16.msra.mxu0 %v706_v12  ;;  %669 = vmatpush1.bf16.msra.mxu1 %v706_v12 }
  0x2d   : > { %381 = vmatprep.subr.bf16.mxu0 %v745_v1  ;;  %658 = vmatprep.subr.bf16.mxu1 %v745_v1 }
  0x30   : > { %382 = vmatpush1.bf16.msra.mxu0 %v707_v13  ;;  %670 = vmatpush1.bf16.msra.mxu1 %v707_v13 }
  0x31   : > { %383 = vmatprep.subr.bf16.mxu0 %v745_v1  ;;  %659 = vmatprep.subr.bf16.mxu1 %v745_v1 }
  0x34   : > { %384 = vmatpush1.bf16.msra.mxu0 %v708_v14  ;;  %671 = vmatpush1.bf16.msra.mxu1 %v708_v14 }
  0x37   : > { %394 = vmatmul.mubr.bf16.vlgmr.msra.gmra.mrb[0].mxu0 %v709_v15  ;;  %410 = vmatmul.mubr.bf16.vlgmr.msra.gmra.mrb[0].mxu1 %v712_v16 }
  0x38   : > { %623 = vmatprep.mubr.msk.bf16.mxu0 %vm348_vm0, %v715_v17  ;;  %625 = vmatprep.mubr.msk.bf16.mxu1 %vm348_vm0, %v717_v18 }
  0x3f   : > { %402 = vmatmul.mubr.bf16.gmra.mrb[4].mxu0 %v719_v19  ;;  %418 = vmatmul.mubr.bf16.gmra.mrb[4].mxu1 %v720_v20 }
 0x10a   : > { %v395_v22 = vpop.f32.mrb[0].mxu0  ;;  %v411_v24 = vpop.f32.mrb[0].mxu1 }
 0x10b   : > { %v431_v25 = vmul.f32 %v626_v21, %v395_v22  ;;  %v435_v26 = vmul.f32 %v626_v21, %v411_v24  ;;  %v397_v27 = vpop.f32.mrb[1].mxu0  ;;  %v413_v28 = vpop.f32.mrb[1].mxu1 }
 0x10c   : > { %v398_v29 = vpop.f32.mrb[2].mxu0  ;;  %v414_v30 = vpop.f32.mrb[2].mxu1 }
 0x10d   : > { %v444_v31 = vadd.f32 %v627_v23, %v431_v25  ;;  %v448_v32 = vadd.f32 %v627_v23, %v435_v26  ;;  %v432_v33 = vmul.f32 %v626_v21, %v398_v29  ;;  %v436_v34 = vmul.f32 %v626_v21, %v414_v30  ;;  %v400_v35 = vpop.f32.mrb[3].mxu0  ;;  %v416_v36 = vpop.f32.mrb[3].mxu1 }
 0x10f   : > { %v452_v37 = vmax.f32 %v444_v31, 0.0  ;;  %v456_v38 = vmax.f32 %v448_v32, 0.0  ;;  %v445_v39 = vadd.f32 %v627_v23, %v432_v33  ;;  %v449_v40 = vadd.f32 %v627_v23, %v436_v34 }
 0x111   : > { %v640_v41 = vpack.c.bf16 %v452_v37, %v452_v37  ;;  %v644_v42 = vpack.c.bf16 %v456_v38, %v456_v38  ;;  %v453_v43 = vmax.f32 %v445_v39, 0.0  ;;  %v457_v44 = vmax.f32 %v449_v40, 0.0 }
 0x112   : > { %v403_v45 = vpop.f32.mrb[4].mxu0  ;;  %v419_v46 = vpop.f32.mrb[4].mxu1 }
 0x113   : > { %493 = vst.msk [vmem:[%s874_s28] sm:$0xf] %vm492_vm1, %v640_v41  ;;  %497 = vst.msk [vmem:[%s874_s28 + $0x10] sm:$0xf] %vm492_vm1, %v644_v42  ;;  %v641_v47 = vpack.c.bf16 %v453_v43, %v453_v43  ;;  %v645_v48 = vpack.c.bf16 %v457_v44, %v457_v44  ;;  %v433_v49 = vmul.f32 %v626_v21, %v403_v45  ;;  %v405_v51 = vpop.f32.mrb[5].mxu0  ;;  %v421_v52 = vpop.f32.mrb[5].mxu1 }
 0x114   : > { %v437_v50 = vmul.f32 %v626_v21, %v419_v46  ;;  %v406_v53 = vpop.f32.mrb[6].mxu0  ;;  %v422_v54 = vpop.f32.mrb[6].mxu1 }
 0x115   : > { %494 = vst.msk [vmem:[%s874_s28 + $0x4] sm:$0xf] %vm492_vm1, %v641_v47  ;;  %498 = vst.msk [vmem:[%s874_s28 + $0x14] sm:$0xf] %vm492_vm1, %v645_v48  ;;  %v446_v55 = vadd.f32 %v627_v23, %v433_v49  ;;  %v434_v57 = vmul.f32 %v626_v21, %v406_v53  ;;  %v438_v58 = vmul.f32 %v626_v21, %v422_v54  ;;  %v408_v59 = vpop.f32.mrb[7].mxu0  ;;  %v424_v60 = vpop.f32.mrb[7].mxu1 }
 0x116   : > { %v450_v56 = vadd.f32 %v627_v23, %v437_v50 }
 0x117   : > { %v454_v61 = vmax.f32 %v446_v55, 0.0  ;;  %v447_v63 = vadd.f32 %v627_v23, %v434_v57  ;;  %v451_v0 = vadd.f32 %v627_v23, %v438_v58 }
 0x118   : > { %v458_v62 = vmax.f32 %v450_v56, 0.0 }
 0x119   : > { %v642_v1 = vpack.c.bf16 %v454_v61, %v454_v61  ;;  %v455_v3 = vmax.f32 %v447_v63, 0.0  ;;  %v459_v4 = vmax.f32 %v451_v0, 0.0 }
 0x11a   : > { %v646_v2 = vpack.c.bf16 %v458_v62, %v458_v62 }
 0x11b   : > { %495 = vst.msk [vmem:[%s874_s28 + $0x8] sm:$0xf] %vm492_vm1, %v642_v1  ;;  %v643_v5 = vpack.c.bf16 %v455_v3, %v455_v3  ;;  %v647_v6 = vpack.c.bf16 %v459_v4, %v459_v4 }
 0x11c   : > { %499 = vst.msk [vmem:[%s874_s28 + $0x18] sm:$0xf] %vm492_vm1, %v646_v2 }
 0x11d   : > { %496 = vst.msk [vmem:[%s874_s28 + $0xc] sm:$0xf] %vm492_vm1, %v643_v5  ;;  %500 = vst.msk [vmem:[%s874_s28 + $0x1c] sm:$0xf] %vm492_vm1, %v647_v6 }
 0x11e PF: > { %s13_s14 = sadd.s32 1, %s743_s14   ;;  %s905_s12 = smov %s739_s13 }
 0x11f   : > { %p10_p5 = scmp.ge.s32.totalorder %s13_s14, 4   ;;  %s906_s13 = smov %s908_s15 }
 0x121   :  { %12 = sbr.rel (!%p10_p5) target bundleno = 2 (0x2), region = 62 }

// kernel: spatial_path.4
= control target key start
LH: loop header
LB: loop body
LE: loop exit
PB: predicated region body
PF: predicated region fallthrough
CT: control target
= control target key end

     0   :  { %s1574_s12 = smov 0   ;;  %s1576_s13 = smov 0   ;;  %s1853_s0 = inlined_call_operand.vmem [shape: bf16[2,1,40,512], index: 0, kind: input, shape index: {}]   ;;  %s1854_s1 = inlined_call_operand.vmem [shape: bf16[2,512,64], index: 1, kind: input, shape index: {}]   ;;  %s1855_s2 = inlined_call_operand.vmem [shape: f32[2,64], index: 2, kind: input, shape index: {}]   ;;  %s1856_s3 = inlined_call_operand.vmem [shape: bf16[2,1,32,64], index: 3, kind: output, shape index: {}]  }
   0x1   :  { %s1578_s14 = smov 0  }
   0x2 LB: > { %s25_s15 = sadd.s32 1, %s1548_s13  ;;  %p1152_p0 = scmp.ge.s32.totalorder %s1552_s14, 1  ;;  %s1552_s14 = sphi %s1578_s14, %s13_s14   ;;  %s1548_s13 = sphi %s1576_s13, %s1858_s13   ;;  %s1544_s12 = sphi %s1574_s12, %s1857_s12  }
   0x3   : > { %p27_p1 = scmp.ge.s32.totalorder %s25_s15, 2  ;;  %p157_p2 = scmp.lt.s32.totalorder %s1552_s14, 3 }
   0x5   : > { %s1860_s15 = smov (%p27_p1, %s25_s15), 0  ;;  %p158_p3 = pnand %p1152_p0, %p157_p2 }
   0x6   : > { %v1450_v0 = vld [vmem:[%s1854_s1 + $0x140] sm:$0xff] (!%p158_p3)   ;;  %v1454_v4 = vld [vmem:[%s1854_s1 + $0x148] sm:$0xff] (!%p158_p3)   ;;  %v1458_v8 = vld [vmem:[%s1854_s1 + $0x150] sm:$0xff] (!%p158_p3)   ;;  %p189_p4 = scmp.lt.s32.totalorder (!%p158_p3), %s1544_s12, 1  ;;  %vm1051_vm0 = vcmask (!%p158_p3), 519168  }
   0x7   : > { %161 = sbr.rel (%p158_p3) target bundleno = 310 (0x136), region = 32  ;;  %v1451_v1 = vld [vmem:[%s1854_s1 + $0x1c0] sm:$0xff] (!%p158_p3)   ;;  %1313 = vmatprep.subr.bf16.mxu0 (!%p158_p3), %v1450_v0  ;;  %v1455_v5 = vld [vmem:[%s1854_s1 + $0x1c8] sm:$0xff] (!%p158_p3)   ;;  %v1459_v9 = vld [vmem:[%s1854_s1 + $0x1d0] sm:$0xff] (!%p158_p3)  }
   0x8   : > { %v1452_v2 = vld [vmem:[%s1854_s1 + $0x100] sm:$0xff] (!%p158_p3)   ;;  %1341 = vmatprep.subr.bf16.mxu1 (!%p158_p3), %v1451_v1  ;;  %v1456_v6 = vld [vmem:[%s1854_s1 + $0x108] sm:$0xff] (!%p158_p3)   ;;  %v1460_v10 = vld [vmem:[%s1854_s1 + $0x110] sm:$0xff] (!%p158_p3)  }
   0x9   : > { %v1453_v3 = vld [vmem:[%s1854_s1 + $0x180] sm:$0xff] (!%p158_p3)   ;;  %1314 = vmatpush3.bf16.msra.mxu0 (!%p158_p3), %v1452_v2  ;;  %v1457_v7 = vld [vmem:[%s1854_s1 + $0x188] sm:$0xff] (!%p158_p3)   ;;  %v1461_v11 = vld [vmem:[%s1854_s1 + $0x190] sm:$0xff] (!%p158_p3)  }
   0xa   : > { %1342 = vmatpush3.bf16.msra.mxu1 (!%p158_p3), %v1453_v3  ;;  %1315 = vmatprep.subr.bf16.mxu0 (!%p158_p3), %v1454_v4  ;;  %v1462_v12 = vld [vmem:[%s1854_s1 + $0x158] sm:$0xff] (!%p158_p3)   ;;  %v1466_v16 = vld [vmem:[%s1854_s1 + $0x160] sm:$0xff] (!%p158_p3)   ;;  %v1470_v20 = vld [vmem:[%s1854_s1 + $0x168] sm:$0xff] (!%p158_p3)  }
   0xb   : > { %1343 = vmatprep.subr.bf16.mxu1 (!%p158_p3), %v1455_v5  ;;  %v1463_v13 = vld [vmem:[%s1854_s1 + $0x1d8] sm:$0xff] (!%p158_p3)   ;;  %v1467_v17 = vld [vmem:[%s1854_s1 + $0x1e0] sm:$0xff] (!%p158_p3)   ;;  %v1471_v21 = vld [vmem:[%s1854_s1 + $0x1e8] sm:$0xff] (!%p158_p3)  }
   0xc   : > { %v1464_v14 = vld [vmem:[%s1854_s1 + $0x118] sm:$0xff] (!%p158_p3)   ;;  %v1468_v18 = vld [vmem:[%s1854_s1 + $0x120] sm:$0xff] (!%p158_p3)   ;;  %v1472_v22 = vld [vmem:[%s1854_s1 + $0x128] sm:$0xff] (!%p158_p3)  }
   0xd   : > { %1316 = vmatpush3.bf16.msra.mxu0 (!%p158_p3), %v1456_v6  ;;  %v1465_v15 = vld [vmem:[%s1854_s1 + $0x198] sm:$0xff] (!%p158_p3)   ;;  %v1469_v19 = vld [vmem:[%s1854_s1 + $0x1a0] sm:$0xff] (!%p158_p3)   ;;  %v1473_v23 = vld [vmem:[%s1854_s1 + $0x1a8] sm:$0xff] (!%p158_p3)  }
   0xe   : > { %1344 = vmatpush3.bf16.msra.mxu1 %v1457_v7  ;;  %1317 = vmatprep.subr.bf16.mxu0 %v1458_v8  ;;  %s1862_s12 = smov (!%p189_p4, %s1544_s12), 1  ;;  %v1474_v24 = vld [vmem:[%s1854_s1 + $0x170] sm:$0xff]   ;;  %v1478_v28 = vld [vmem:[%s1854_s1 + $0x178] sm:$0xff]   ;;  %v1486_v40 = vld [vmem:[%s1854_s1 + $0x40] sm:$0xff]  }
   0xf   : > { %1345 = vmatprep.subr.bf16.mxu1 %v1459_v9  ;;  %v1475_v25 = vld [vmem:[%s1854_s1 + $0x1f0] sm:$0xff]   ;;  %s1425_s22 = smul.u32 80, %s1862_s12  ;;  %v1479_v29 = vld [vmem:[%s1854_s1 + $0x1f8] sm:$0xff]   ;;  %v1487_v41 = vld [vmem:[%s1854_s1 + $0xc0] sm:$0xff]   ;;  %s1308_s16 = sshll.u32 %s1862_s12, 4 }
  0x10   : > { %v1476_v26 = vld [vmem:[%s1854_s1 + $0x130] sm:$0xff]   ;;  %v1480_v30 = vld [vmem:[%s1854_s1 + $0x138] sm:$0xff]   ;;  %v1488_v42 = vld [vmem:[%s1854_s1] sm:$0xff]   ;;  %s206_s19 = scalar_lea.vmem %s1856_s3, %s1308_s16 }
  0x11   : > { %1318 = vmatpush3.bf16.msra.mxu0 %v1460_v10  ;;  %v1477_v27 = vld [vmem:[%s1854_s1 + $0x1b0] sm:$0xff]   ;;  %s1692_s6 = scalar_lea.vmem %s1853_s0, %s1425_s22  ;;  %v1481_v31 = vld [vmem:[%s1854_s1 + $0x1b8] sm:$0xff]   ;;  %v1489_v43 = vld [vmem:[%s1854_s1 + $0x80] sm:$0xff]  }
  0x12   : > { %1346 = vmatpush3.bf16.msra.mxu1 %v1461_v11  ;;  %1319 = vmatprep.subr.bf16.mxu0 %v1462_v12  ;;  %v1701_v32 = vld [vmem:[%s1692_s6 + $0x10] sm:$0xff]  ;;  %v1704_v33 = vld [vmem:[%s1692_s6 + $0x20] sm:$0xff]  ;;  %v1707_v34 = vld [vmem:[%s1692_s6 + $0x18] sm:$0xff] }
  0x13   : > { %1347 = vmatprep.subr.bf16.mxu1 %v1463_v13  ;;  %v1220_v35 = vcombine.low %v1701_v32, %v1704_v33  ;;  %v1221_v36 = vcombine.high %v1701_v32, %v1704_v33  ;;  %v1714_v37 = vld [vmem:[%s1692_s6 + $0x28] sm:$0xff]  ;;  %v1494_v48 = vld [vmem:[%s1854_s1 + $0x50] sm:$0xff]   ;;  %v1498_v52 = vld [vmem:[%s1854_s1 + $0x58] sm:$0xff]  }
  0x14   : > { %v1222_v38 = vcombine.low %v1707_v34, %v1714_v37  ;;  %v1223_v39 = vcombine.high %v1707_v34, %v1714_v37  ;;  %v1490_v44 = vld [vmem:[%s1854_s1 + $0x48] sm:$0xff]   ;;  %v1495_v49 = vld [vmem:[%s1854_s1 + $0xd0] sm:$0xff]   ;;  %v1499_v53 = vld [vmem:[%s1854_s1 + $0xd8] sm:$0xff]  }
  0x15   : > { %1320 = vmatpush3.bf16.msra.mxu0 %v1464_v14  ;;  %617 = vmatprep.mubr.bf16.mxu0 %v1221_v36  ;;  %v1491_v45 = vld [vmem:[%s1854_s1 + $0xc8] sm:$0xff]   ;;  %v1496_v50 = vld [vmem:[%s1854_s1 + $0x10] sm:$0xff]   ;;  %v1500_v54 = vld [vmem:[%s1854_s1 + $0x18] sm:$0xff]  }
  0x16   : > { %1348 = vmatpush3.bf16.msra.mxu1 %v1465_v15  ;;  %1321 = vmatprep.subr.bf16.mxu0 %v1466_v16  ;;  %v1492_v46 = vld [vmem:[%s1854_s1 + $0x8] sm:$0xff]   ;;  %v1497_v51 = vld [vmem:[%s1854_s1 + $0x90] sm:$0xff]   ;;  %v1501_v55 = vld [vmem:[%s1854_s1 + $0x98] sm:$0xff]  }
  0x17   : > { %1349 = vmatprep.subr.bf16.mxu1 %v1467_v17  ;;  %666 = vmatprep.mubr.bf16.mxu1 %v1223_v39  ;;  %v1493_v47 = vld [vmem:[%s1854_s1 + $0x88] sm:$0xff]   ;;  %v1502_v56 = vld [vmem:[%s1854_s1 + $0x60] sm:$0xff]   ;;  %v284_v60 = vld [vmem:[%s1692_s6 + $0x30] sm:$0xff] }
  0x18   : > { %v1503_v57 = vld [vmem:[%s1854_s1 + $0xe0] sm:$0xff]   ;;  %v285_v63 = vld [vmem:[%s1692_s6 + $0x38] sm:$0xff]  ;;  %v287_v0 = vld [vmem:[%s1692_s6 + $0x48] sm:$0xff] }
  0x19   : > { %1322 = vmatpush3.bf16.msra.mxu0 %v1468_v18  ;;  %v1504_v58 = vld [vmem:[%s1854_s1 + $0x20] sm:$0xff]   ;;  %v1227_v2 = vcombine.high %v285_v63, %v287_v0  ;;  %v1508_v3 = vld [vmem:[%s1854_s1 + $0x68] sm:$0xff]   ;;  %v1226_v4 = vcombine.low %v285_v63, %v287_v0  ;;  %v1514_v8 = vld [vmem:[%s1854_s1 + $0x70] sm:$0xff]  }
  0x1a   : > { %1350 = vmatpush3.bf16.msra.mxu1 %v1469_v19  ;;  %1323 = vmatprep.subr.bf16.mxu0 %v1470_v20  ;;  %v1505_v59 = vld [vmem:[%s1854_s1 + $0xa0] sm:$0xff]   ;;  %v1509_v5 = vld [vmem:[%s1854_s1 + $0xe8] sm:$0xff]   ;;  %v1515_v9 = vld [vmem:[%s1854_s1 + $0xf0] sm:$0xff]   ;;  %v1265_v20 = vcombine.high %v1704_v33, %v284_v60 }
  0x1b   : > { %1351 = vmatprep.subr.bf16.mxu1 %v1471_v21  ;;  %v286_v61 = vld [vmem:[%s1692_s6 + $0x40] sm:$0xff]  ;;  %v1512_v6 = vld [vmem:[%s1854_s1 + $0x28] sm:$0xff]   ;;  %v1516_v10 = vld [vmem:[%s1854_s1 + $0x30] sm:$0xff]  }
  0x1c   : > { %v1225_v62 = vcombine.high %v284_v60, %v286_v61  ;;  %v1224_v1 = vcombine.low %v284_v60, %v286_v61  ;;  %v1513_v7 = vld [vmem:[%s1854_s1 + $0xa8] sm:$0xff]   ;;  %v1517_v11 = vld [vmem:[%s1854_s1 + $0xb0] sm:$0xff]   ;;  %v1518_v12 = vld [vmem:[%s1854_s1 + $0x78] sm:$0xff]  }
  0x1d   : > { %1324 = vmatpush3.bf16.msra.mxu0 %v1472_v22  ;;  %v1519_v13 = vld [vmem:[%s1854_s1 + $0xf8] sm:$0xff]   ;;  %v208_v16 = vld [vmem:[%s1692_s6] sm:$0xff]  ;;  %v209_v19 = vld [vmem:[%s1692_s6 + $0x8] sm:$0xff] }
  0x1e   : > { %1352 = vmatpush3.bf16.msra.mxu1 %v1473_v23  ;;  %1325 = vmatprep.subr.bf16.mxu0 %v1474_v24  ;;  %v1520_v14 = vld [vmem:[%s1854_s1 + $0x38] sm:$0xff]   ;;  %v1260_v17 = vcombine.low %v208_v16, %v1701_v32  ;;  %v1261_v18 = vcombine.high %v208_v16, %v1701_v32  ;;  %v1262_v21 = vcombine.low %v209_v19, %v1707_v34 }
  0x1f   : > { %1353 = vmatprep.subr.bf16.mxu1 %v1475_v25  ;;  %v1521_v15 = vld [vmem:[%s1854_s1 + $0xb8] sm:$0xff]   ;;  %v1263_v22 = vcombine.high %v209_v19, %v1707_v34  ;;  %v1267_v23 = vcombine.high %v1714_v37, %v285_v63  ;;  %v1264_v24 = vcombine.low %v1704_v33, %v284_v60  ;;  %v1266_v25 = vcombine.low %v1714_v37, %v285_v63 }
  0x21   : > { %1326 = vmatpush3.bf16.msra.mxu0 %v1476_v26 }
  0x22   : > { %1354 = vmatpush3.bf16.msra.mxu1 %v1477_v27  ;;  %1327 = vmatprep.subr.bf16.mxu0 %v1478_v28 }
  0x23   : > { %1355 = vmatprep.subr.bf16.mxu1 %v1479_v29 }
  0x25   : > { %1328 = vmatpush3.bf16.msra.mxu0 %v1480_v30 }
  0x26   : > { %1356 = vmatpush3.bf16.msra.mxu1 %v1481_v31  ;;  %1369 = vmatprep.subr.bf16.mxu0 %v1486_v40 }
  0x27   : > { %1397 = vmatprep.subr.bf16.mxu1 %v1487_v41 }
  0x28   : > { %618 = vmatmul.mubr.bf16.vlgmr.msra.gmra.mrb[0].mxu0 %v1220_v35 }
  0x29   : > { %667 = vmatmul.mubr.bf16.vlgmr.msra.gmra.mrb[0].mxu1 %v1222_v38  ;;  %1370 = vmatpush3.bf16.msra.mxu0 %v1488_v42 }
  0x2a   : > { %1398 = vmatpush3.bf16.msra.mxu1 %v1489_v43  ;;  %1371 = vmatprep.subr.bf16.mxu0 %v1490_v44 }
  0x2b   : > { %1399 = vmatprep.subr.bf16.mxu1 %v1491_v45  ;;  %625 = vmatprep.mubr.bf16.mxu0 %v1225_v62 }
  0x2c   : > { %674 = vmatprep.mubr.bf16.mxu1 %v1227_v2  ;;  %v1300_v2 = vld [vmem:[%s1855_s2] ss:$0 sm:$0xff] }
  0x2d   : > { %1372 = vmatpush3.bf16.msra.mxu0 %v1492_v46 }
  0x2e   : > { %1400 = vmatpush3.bf16.msra.mxu1 %v1493_v47  ;;  %1373 = vmatprep.subr.bf16.mxu0 %v1494_v48 }
  0x2f   : > { %1401 = vmatprep.subr.bf16.mxu1 %v1495_v49 }
  0x30   : > { %626 = vmatmul.mubr.bf16.gmra.mrb[4].mxu0 %v1224_v1 }
  0x31   : > { %1374 = vmatpush3.bf16.msra.mxu0 %v1496_v50  ;;  %675 = vmatmul.mubr.bf16.gmra.mrb[4].mxu1 %v1226_v4 }
  0x32   : > { %1402 = vmatpush3.bf16.msra.mxu1 %v1497_v51  ;;  %1375 = vmatprep.subr.bf16.mxu0 %v1498_v52 }
  0x33   : > { %1403 = vmatprep.subr.bf16.mxu1 %v1499_v53  ;;  %947 = vmatprep.mubr.bf16.mxu0 %v1261_v18 }
  0x34   : > { %996 = vmatprep.mubr.bf16.mxu1 %v1263_v22 }
  0x35   : > { %1376 = vmatpush3.bf16.msra.mxu0 %v1500_v54 }
  0x36   : > { %1404 = vmatpush3.bf16.msra.mxu1 %v1501_v55  ;;  %1377 = vmatprep.subr.bf16.mxu0 %v1502_v56 }
  0x37   : > { %1405 = vmatprep.subr.bf16.mxu1 %v1503_v57 }
  0x39   : > { %1378 = vmatpush3.bf16.msra.mxu0 %v1504_v58 }
  0x3a   : > { %1406 = vmatpush3.bf16.msra.mxu1 %v1505_v59  ;;  %1379 = vmatprep.subr.bf16.mxu0 %v1508_v3 }
  0x3b   : > { %1407 = vmatprep.subr.bf16.mxu1 %v1509_v5 }
  0x3d   : > { %1380 = vmatpush3.bf16.msra.mxu0 %v1512_v6  ;;  %v1301_v6 = vld [vmem:[%s1855_s2 + $0x1] ss:$0 sm:$0xff] }
  0x3e   : > { %1408 = vmatpush3.bf16.msra.mxu1 %v1513_v7  ;;  %1381 = vmatprep.subr.bf16.mxu0 %v1514_v8 }
  0x3f   : > { %1409 = vmatprep.subr.bf16.mxu1 %v1515_v9 }
  0x41   : > { %1382 = vmatpush3.bf16.msra.mxu0 %v1516_v10 }
  0x42   : > { %1410 = vmatpush3.bf16.msra.mxu1 %v1517_v11  ;;  %1383 = vmatprep.subr.bf16.mxu0 %v1518_v12 }
  0x43   : > { %1411 = vmatprep.subr.bf16.mxu1 %v1519_v13 }
  0x45   : > { %1384 = vmatpush3.bf16.msra.mxu0 %v1520_v14 }
  0x46   : > { %1412 = vmatpush3.bf16.msra.mxu1 %v1521_v15 }
  0x48   : > { %948 = vmatmul.mubr.bf16.vlgmr.msra.gmra.mrb[8].mxu0 %v1260_v17 }
  0x49   : > { %997 = vmatmul.mubr.bf16.vlgmr.msra.gmra.mrb[8].mxu1 %v1262_v21  ;;  %955 = vmatprep.mubr.bf16.mxu0 %v1265_v20 }
  0x4a   : > { %1004 = vmatprep.mubr.bf16.mxu1 %v1267_v23 }
  0x50   : > { %956 = vmatmul.mubr.bf16.gmra.mrb[12].mxu0 %v1264_v24 }
  0x51   : > { %1005 = vmatmul.mubr.bf16.gmra.mrb[12].mxu1 %v1266_v25 }
  0xfb   : > { %v1329_v26 = vpop.f32.mrb[0].mxu0 }
  0xfc   : > { %v1357_v27 = vpop.f32.mrb[0].mxu1  ;;  %v1330_v28 = vpop.f32.mrb[1].mxu0 }
  0xfd   : > { %v1331_v29 = vadd.f32 %v1330_v28, %v1329_v26  ;;  %v1358_v30 = vpop.f32.mrb[1].mxu1  ;;  %v1332_v31 = vpop.f32.mrb[2].mxu0 }
  0xfe   : > { %v1359_v32 = vadd.f32 %v1358_v30, %v1357_v27  ;;  %v1360_v34 = vpop.f32.mrb[2].mxu1  ;;  %v1333_v35 = vpop.f32.mrb[3].mxu0 }
  0xff   : > { %v1334_v36 = vadd.f32 %v1333_v35, %v1332_v31  ;;  %v1361_v38 = vpop.f32.mrb[3].mxu1 }
 0x100   : > { %v669_v39 = vadd.f32 %v1359_v32, %v1331_v29  ;;  %v1362_v40 = vadd.f32 %v1361_v38, %v1360_v34 }
 0x102   : > { %v672_v41 = vadd.f32 %v1362_v40, %v1334_v36 }
 0x103   : > { %v1335_v42 = vpop.f32.mrb[4].mxu0 }
 0x104   : > { %v1363_v33 = vpop.f32.mrb[4].mxu1  ;;  %v1336_v43 = vpop.f32.mrb[5].mxu0 }
 0x105   : > { %v1337_v37 = vadd.f32 %v1336_v43, %v1335_v42  ;;  %v1364_v44 = vpop.f32.mrb[5].mxu1  ;;  %v1338_v45 = vpop.f32.mrb[6].mxu0 }
 0x106   : > { %v1365_v46 = vadd.f32 %v1364_v44, %v1363_v33  ;;  %v1366_v47 = vpop.f32.mrb[6].mxu1  ;;  %v1339_v48 = vpop.f32.mrb[7].mxu0 }
 0x107   : > { %v1340_v49 = vadd.f32 %v1339_v48, %v1338_v45  ;;  %v1367_v50 = vpop.f32.mrb[7].mxu1 }
 0x108   : > { %v677_v51 = vadd.f32 %v1365_v46, %v1337_v37  ;;  %v1368_v52 = vadd.f32 %v1367_v50, %v1366_v47 }
 0x10a   : > { %v680_v53 = vadd.f32 %v1368_v52, %v1340_v49 }
 0x11b   : > { %v1385_v54 = vpop.f32.mrb[8].mxu0 }
 0x11c   : > { %v1413_v55 = vpop.f32.mrb[8].mxu1  ;;  %v1386_v56 = vpop.f32.mrb[9].mxu0 }
 0x11d   : > { %v1387_v57 = vadd.f32 %v1386_v56, %v1385_v54  ;;  %v1414_v58 = vpop.f32.mrb[9].mxu1  ;;  %v1388_v59 = vpop.f32.mrb[10].mxu0 }
 0x11e   : > { %v1415_v60 = vadd.f32 %v1414_v58, %v1413_v55  ;;  %v1416_v61 = vpop.f32.mrb[10].mxu1  ;;  %v1389_v62 = vpop.f32.mrb[11].mxu0 }
 0x11f   : > { %v950_v63 = vadd.f32 %v1387_v57, %v669_v39  ;;  %v1390_v0 = vadd.f32 %v1389_v62, %v1388_v59  ;;  %v1417_v1 = vpop.f32.mrb[11].mxu1 }
 0x120   : > { %v1418_v3 = vadd.f32 %v1417_v1, %v1416_v61 }
 0x121   : > { %v999_v4 = vadd.f32 %v1415_v60, %v950_v63  ;;  %v953_v5 = vadd.f32 %v1390_v0, %v672_v41 }
 0x123   : > { %v1018_v7 = vmul.f32 %v1300_v2, %v999_v4  ;;  %v1002_v8 = vadd.f32 %v1418_v3, %v953_v5  ;;  %v1391_v9 = vpop.f32.mrb[12].mxu0 }
 0x124   : > { %v1419_v10 = vpop.f32.mrb[12].mxu1  ;;  %v1392_v11 = vpop.f32.mrb[13].mxu0 }
 0x125   : > { %v1027_v12 = vadd.f32 %v1301_v6, %v1018_v7  ;;  %v1019_v13 = vmul.f32 %v1300_v2, %v1002_v8  ;;  %v1393_v14 = vadd.f32 %v1392_v11, %v1391_v9  ;;  %v1420_v15 = vpop.f32.mrb[13].mxu1  ;;  %v1394_v16 = vpop.f32.mrb[14].mxu0 }
 0x126   : > { %v1421_v17 = vadd.f32 %v1420_v15, %v1419_v10  ;;  %v1422_v18 = vpop.f32.mrb[14].mxu1  ;;  %v1395_v19 = vpop.f32.mrb[15].mxu0 }
 0x127   : > { %v1031_v20 = vmax.f32 %v1027_v12, 0.0  ;;  %v1028_v21 = vadd.f32 %v1301_v6, %v1019_v13  ;;  %v958_v22 = vadd.f32 %v1393_v14, %v677_v51  ;;  %v1396_v23 = vadd.f32 %v1395_v19, %v1394_v16  ;;  %v1423_v24 = vpop.f32.mrb[15].mxu1 }
 0x128   : > { %v1424_v25 = vadd.f32 %v1423_v24, %v1422_v18 }
 0x129   : > { %v1309_v26 = vpack.c.bf16 %v1031_v20, %v1031_v20  ;;  %v1032_v27 = vmax.f32 %v1028_v21, 0.0  ;;  %v1007_v28 = vadd.f32 %v1421_v17, %v958_v22  ;;  %v961_v29 = vadd.f32 %v1396_v23, %v680_v53 }
 0x12b   : > { %1052 = vst.msk [vmem:[%s206_s19] sm:$0xf] %vm1051_vm0, %v1309_v26  ;;  %v1310_v30 = vpack.c.bf16 %v1032_v27, %v1032_v27  ;;  %v1020_v31 = vmul.f32 %v1300_v2, %v1007_v28  ;;  %v1010_v32 = vadd.f32 %v1424_v25, %v961_v29 }
 0x12d   : > { %1053 = vst.msk [vmem:[%s206_s19 + $0x4] sm:$0xf] %vm1051_vm0, %v1310_v30  ;;  %v1029_v34 = vadd.f32 %v1301_v6, %v1020_v31  ;;  %v1021_v35 = vmul.f32 %v1300_v2, %v1010_v32 }
 0x12f   : > { %v1033_v36 = vmax.f32 %v1029_v34, 0.0  ;;  %v1030_v38 = vadd.f32 %v1301_v6, %v1021_v35 }
 0x131   : > { %v1311_v39 = vpack.c.bf16 %v1033_v36, %v1033_v36  ;;  %v1034_v40 = vmax.f32 %v1030_v38, 0.0 }
 0x133   : > { %1054 = vst.msk [vmem:[%s206_s19 + $0x8] sm:$0xf] %vm1051_vm0, %v1311_v39  ;;  %v1312_v41 = vpack.c.bf16 %v1034_v40, %v1034_v40 }
 0x135   : > { %1055 = vst.msk [vmem:[%s206_s19 + $0xc] sm:$0xf] %vm1051_vm0, %v1312_v41 }
 0x136 PF: > { %s13_s14 = sadd.s32 1, %s1552_s14   ;;  %s1857_s12 = smov %s1548_s13 }
 0x137   : > { %p10_p5 = scmp.ge.s32.totalorder %s13_s14, 4   ;;  %s1858_s13 = smov %s1860_s15 }
 0x139   :  { %12 = sbr.rel (!%p10_p5) target bundleno = 2 (0x2), region = 63 }

// kernel: spatial_path.5
= control target key start
LH: loop header
LB: loop body
LE: loop exit
PB: predicated region body
PF: predicated region fallthrough
CT: control target
= control target key end

     0   :  { %s1611_s18 = smov 0   ;;  %s1613_s19 = smov 0   ;;  %s1888_s0 = inlined_call_operand.vmem [shape: bf16[2,1,24,512], index: 0, kind: input, shape index: {}]   ;;  %s1889_s1 = inlined_call_operand.vmem [shape: bf16[2,512,64], index: 1, kind: input, shape index: {}]   ;;  %s1890_s2 = inlined_call_operand.vmem [shape: f32[2,64], index: 2, kind: input, shape index: {}]   ;;  %s1891_s3 = inlined_call_operand.vmem [shape: bf16[64,128], index: 3, kind: input, shape index: {}]   ;;  %s1892_s4 = inlined_call_operand.vmem [shape: f32[2,128], index: 4, kind: input, shape index: {}]   ;;  %s1893_s5 = inlined_call_operand.vmem [shape: f32[2,1,16,128], index: 5, kind: output, shape index: {}]  }
   0x1   :  { %s1615_s20 = smov 0  }
   0x2 LB: > { %s27_s21 = sadd.s32 1, %s1573_s19  ;;  %p1195_p0 = scmp.ge.s32.totalorder %s1577_s20, 1  ;;  %s1577_s20 = sphi %s1615_s20, %s15_s20   ;;  %s1573_s19 = sphi %s1613_s19, %s1895_s19   ;;  %s1569_s18 = sphi %s1611_s18, %s1894_s18  }
   0x3   : > { %p29_p1 = scmp.ge.s32.totalorder %s27_s21, 2  ;;  %p207_p2 = scmp.lt.s32.totalorder %s1577_s20, 3 }
   0x5   : > { %s1897_s21 = smov (%p29_p1, %s27_s21), 0  ;;  %p208_p3 = pnand %p1195_p0, %p207_p2 }
   0x6   : > { %v1479_v0 = vld [vmem:[%s1889_s1 + $0x140] sm:$0xff] (!%p208_p3)   ;;  %v1483_v4 = vld [vmem:[%s1889_s1 + $0x148] sm:$0xff] (!%p208_p3)   ;;  %v1487_v8 = vld [vmem:[%s1889_s1 + $0x150] sm:$0xff] (!%p208_p3)   ;;  %p243_p4 = scmp.lt.s32.totalorder (!%p208_p3), %s1569_s18, 1  ;;  %vm1580_vm0 = vmmov (!%p208_p3), 0   ;;  %vm1036_vm1 = vcmask (!%p208_p3), 523264  }
   0x7   : > { %211 = sbr.rel (%p208_p3) target bundleno = 522 (0x20a), region = 40  ;;  %v1480_v1 = vld [vmem:[%s1889_s1 + $0x1c0] sm:$0xff] (!%p208_p3)   ;;  %1347 = vmatprep.subr.bf16.mxu0 (!%p208_p3), %v1479_v0  ;;  %v1484_v5 = vld [vmem:[%s1889_s1 + $0x1c8] sm:$0xff] (!%p208_p3)   ;;  %v1488_v9 = vld [vmem:[%s1889_s1 + $0x1d0] sm:$0xff] (!%p208_p3)  }
   0x8   : > { %v1481_v2 = vld [vmem:[%s1889_s1 + $0x100] sm:$0xff] (!%p208_p3)   ;;  %1369 = vmatprep.subr.bf16.mxu1 (!%p208_p3), %v1480_v1  ;;  %v1485_v6 = vld [vmem:[%s1889_s1 + $0x108] sm:$0xff] (!%p208_p3)   ;;  %v1489_v10 = vld [vmem:[%s1889_s1 + $0x110] sm:$0xff] (!%p208_p3)  }
   0x9   : > { %v1482_v3 = vld [vmem:[%s1889_s1 + $0x180] sm:$0xff] (!%p208_p3)   ;;  %1348 = vmatpush3.bf16.msra.mxu0 (!%p208_p3), %v1481_v2  ;;  %v1486_v7 = vld [vmem:[%s1889_s1 + $0x188] sm:$0xff] (!%p208_p3)   ;;  %v1490_v11 = vld [vmem:[%s1889_s1 + $0x190] sm:$0xff] (!%p208_p3)  }
   0xa   : > { %1370 = vmatpush3.bf16.msra.mxu1 (!%p208_p3), %v1482_v3  ;;  %1349 = vmatprep.subr.bf16.mxu0 (!%p208_p3), %v1483_v4  ;;  %v1491_v12 = vld [vmem:[%s1889_s1 + $0x158] sm:$0xff] (!%p208_p3)   ;;  %v1495_v16 = vld [vmem:[%s1889_s1 + $0x160] sm:$0xff] (!%p208_p3)   ;;  %v1499_v20 = vld [vmem:[%s1889_s1 + $0x168] sm:$0xff] (!%p208_p3)  }
   0xb   : > { %1371 = vmatprep.subr.bf16.mxu1 (!%p208_p3), %v1484_v5  ;;  %v1492_v13 = vld [vmem:[%s1889_s1 + $0x1d8] sm:$0xff] (!%p208_p3)   ;;  %v1496_v17 = vld [vmem:[%s1889_s1 + $0x1e0] sm:$0xff] (!%p208_p3)   ;;  %v1500_v21 = vld [vmem:[%s1889_s1 + $0x1e8] sm:$0xff] (!%p208_p3)  }
   0xc   : > { %v1493_v14 = vld [vmem:[%s1889_s1 + $0x118] sm:$0xff] (!%p208_p3)   ;;  %v1497_v18 = vld [vmem:[%s1889_s1 + $0x120] sm:$0xff] (!%p208_p3)   ;;  %v1501_v22 = vld [vmem:[%s1889_s1 + $0x128] sm:$0xff] (!%p208_p3)  }
   0xd   : > { %1350 = vmatpush3.bf16.msra.mxu0 (!%p208_p3), %v1485_v6  ;;  %v1494_v15 = vld [vmem:[%s1889_s1 + $0x198] sm:$0xff] (!%p208_p3)   ;;  %v1498_v19 = vld [vmem:[%s1889_s1 + $0x1a0] sm:$0xff] (!%p208_p3)   ;;  %v1502_v23 = vld [vmem:[%s1889_s1 + $0x1a8] sm:$0xff] (!%p208_p3)  }
   0xe   : > { %1372 = vmatpush3.bf16.msra.mxu1 %v1486_v7  ;;  %1351 = vmatprep.subr.bf16.mxu0 %v1487_v8  ;;  %s1899_s18 = smov (!%p243_p4, %s1569_s18), 1  ;;  %v1503_v24 = vld [vmem:[%s1889_s1 + $0x170] sm:$0xff]   ;;  %v1507_v28 = vld [vmem:[%s1889_s1 + $0x178] sm:$0xff]   ;;  %v1515_v40 = vld [vmem:[%s1889_s1 + $0x40] sm:$0xff]  }
   0xf   : > { %1373 = vmatprep.subr.bf16.mxu1 %v1488_v9  ;;  %v1504_v25 = vld [vmem:[%s1889_s1 + $0x1f0] sm:$0xff]   ;;  %s1452_s7 = smul.u32 48, %s1899_s18  ;;  %v1508_v29 = vld [vmem:[%s1889_s1 + $0x1f8] sm:$0xff]   ;;  %v1516_v41 = vld [vmem:[%s1889_s1 + $0xc0] sm:$0xff]   ;;  %s1346_s26 = sshll.u32 %s1899_s18, 4 }
  0x10   : > { %v1505_v26 = vld [vmem:[%s1889_s1 + $0x130] sm:$0xff]   ;;  %v1509_v30 = vld [vmem:[%s1889_s1 + $0x138] sm:$0xff]   ;;  %v1517_v42 = vld [vmem:[%s1889_s1] sm:$0xff]   ;;  %s260_s29 = scalar_lea.vmem %s1893_s5, %s1346_s26 }
  0x11   : > { %1352 = vmatpush3.bf16.msra.mxu0 %v1489_v10  ;;  %v1506_v27 = vld [vmem:[%s1889_s1 + $0x1b0] sm:$0xff]   ;;  %s1729_s22 = scalar_lea.vmem %s1888_s0, %s1452_s7  ;;  %v1510_v31 = vld [vmem:[%s1889_s1 + $0x1b8] sm:$0xff]   ;;  %v1518_v43 = vld [vmem:[%s1889_s1 + $0x80] sm:$0xff]  }
  0x12   : > { %1374 = vmatpush3.bf16.msra.mxu1 %v1490_v11  ;;  %1353 = vmatprep.subr.bf16.mxu0 %v1491_v12  ;;  %v1738_v32 = vld [vmem:[%s1729_s22 + $0x10] sm:$0xff]  ;;  %v332_v33 = vld [vmem:[%s1729_s22 + $0x20] sm:$0xff]  ;;  %v1742_v34 = vld [vmem:[%s1729_s22 + $0x18] sm:$0xff] }
  0x13   : > { %1375 = vmatprep.subr.bf16.mxu1 %v1492_v13  ;;  %v1263_v35 = vcombine.low %v1738_v32, %v332_v33  ;;  %v1264_v36 = vcombine.high %v1738_v32, %v332_v33  ;;  %v333_v37 = vld [vmem:[%s1729_s22 + $0x28] sm:$0xff]  ;;  %v1523_v48 = vld [vmem:[%s1889_s1 + $0x50] sm:$0xff]   ;;  %v1527_v52 = vld [vmem:[%s1889_s1 + $0x58] sm:$0xff]  }
  0x14   : > { %v1265_v38 = vcombine.low %v1742_v34, %v333_v37  ;;  %v1266_v39 = vcombine.high %v1742_v34, %v333_v37  ;;  %v1519_v44 = vld [vmem:[%s1889_s1 + $0x48] sm:$0xff]   ;;  %v1524_v49 = vld [vmem:[%s1889_s1 + $0xd0] sm:$0xff]   ;;  %v1528_v53 = vld [vmem:[%s1889_s1 + $0xd8] sm:$0xff]  }
  0x15   : > { %1354 = vmatpush3.bf16.msra.mxu0 %v1493_v14  ;;  %643 = vmatprep.mubr.bf16.mxu0 %v1264_v36  ;;  %v1520_v45 = vld [vmem:[%s1889_s1 + $0xc8] sm:$0xff]   ;;  %v1525_v50 = vld [vmem:[%s1889_s1 + $0x10] sm:$0xff]   ;;  %v1529_v54 = vld [vmem:[%s1889_s1 + $0x18] sm:$0xff]  }
  0x16   : > { %1376 = vmatpush3.bf16.msra.mxu1 %v1494_v15  ;;  %1355 = vmatprep.subr.bf16.mxu0 %v1495_v16  ;;  %v1521_v46 = vld [vmem:[%s1889_s1 + $0x8] sm:$0xff]   ;;  %v1526_v51 = vld [vmem:[%s1889_s1 + $0x90] sm:$0xff]   ;;  %v1530_v55 = vld [vmem:[%s1889_s1 + $0x98] sm:$0xff]   ;;  %v1579_v15 = vmov 0.0  }
  0x17   : > { %1377 = vmatprep.subr.bf16.mxu1 %v1496_v17  ;;  %684 = vmatprep.mubr.bf16.mxu1 %v1266_v39  ;;  %v1522_v47 = vld [vmem:[%s1889_s1 + $0x88] sm:$0xff]   ;;  %v1531_v56 = vld [vmem:[%s1889_s1 + $0x60] sm:$0xff]   ;;  %v1539_v0 = vld [vmem:[%s1889_s1 + $0x70] sm:$0xff]  }
  0x18   : > { %v1532_v57 = vld [vmem:[%s1889_s1 + $0xe0] sm:$0xff]   ;;  %v1535_v60 = vld [vmem:[%s1889_s1 + $0x68] sm:$0xff]   ;;  %v1540_v1 = vld [vmem:[%s1889_s1 + $0xf0] sm:$0xff]  }
  0x19   : > { %1356 = vmatpush3.bf16.msra.mxu0 %v1497_v18  ;;  %v1533_v58 = vld [vmem:[%s1889_s1 + $0x20] sm:$0xff]   ;;  %v1536_v61 = vld [vmem:[%s1889_s1 + $0xe8] sm:$0xff]   ;;  %v1541_v2 = vld [vmem:[%s1889_s1 + $0x30] sm:$0xff]  }
  0x1a   : > { %1378 = vmatpush3.bf16.msra.mxu1 %v1498_v19  ;;  %1357 = vmatprep.subr.bf16.mxu0 %v1499_v20  ;;  %v1534_v59 = vld [vmem:[%s1889_s1 + $0xa0] sm:$0xff]   ;;  %v1537_v62 = vld [vmem:[%s1889_s1 + $0x28] sm:$0xff]   ;;  %v1542_v3 = vld [vmem:[%s1889_s1 + $0xb0] sm:$0xff]  }
  0x1b   : > { %1379 = vmatprep.subr.bf16.mxu1 %v1500_v21  ;;  %v1538_v63 = vld [vmem:[%s1889_s1 + $0xa8] sm:$0xff]   ;;  %v1543_v4 = vld [vmem:[%s1889_s1 + $0x78] sm:$0xff]   ;;  %v262_v8 = vld [vmem:[%s1729_s22] sm:$0xff] }
  0x1c   : > { %v1544_v5 = vld [vmem:[%s1889_s1 + $0xf8] sm:$0xff]   ;;  %v263_v9 = vld [vmem:[%s1729_s22 + $0x8] sm:$0xff]  ;;  %v1299_v10 = vcombine.low %v262_v8, %v1738_v32  ;;  %v1300_v11 = vcombine.high %v262_v8, %v1738_v32  ;;  %v1551_v14 = vld [vmem:[%s1891_s3] sm:$0xff]  }
  0x1d   : > { %1358 = vmatpush3.bf16.msra.mxu0 %v1501_v22  ;;  %v1545_v6 = vld [vmem:[%s1889_s1 + $0x38] sm:$0xff]   ;;  %v1301_v12 = vcombine.low %v263_v9, %v1742_v34  ;;  %v1302_v13 = vcombine.high %v263_v9, %v1742_v34  ;;  %v1552_v16 = vld [vmem:[%s1891_s3 + $0x8] sm:$0xff]   ;;  %v1553_v17 = vld [vmem:[%s1891_s3 + $0x10] sm:$0xff]  }
  0x1e   : > { %1380 = vmatpush3.bf16.msra.mxu1 %v1502_v23  ;;  %1359 = vmatprep.subr.bf16.mxu0 %v1503_v24  ;;  %v1546_v7 = vld [vmem:[%s1889_s1 + $0xb8] sm:$0xff]  }
  0x1f   : > { %1381 = vmatprep.subr.bf16.mxu1 %v1504_v25  ;;  %v1554_v18 = vld [vmem:[%s1891_s3 + $0x18] sm:$0xff]  }
  0x21   : > { %1360 = vmatpush3.bf16.msra.mxu0 %v1505_v26 }
  0x22   : > { %1382 = vmatpush3.bf16.msra.mxu1 %v1506_v27  ;;  %1361 = vmatprep.subr.bf16.mxu0 %v1507_v28 }
  0x23   : > { %1383 = vmatprep.subr.bf16.mxu1 %v1508_v29 }
  0x25   : > { %1362 = vmatpush3.bf16.msra.mxu0 %v1509_v30 }
  0x26   : > { %1384 = vmatpush3.bf16.msra.mxu1 %v1510_v31  ;;  %1391 = vmatprep.subr.bf16.mxu0 %v1515_v40 }
  0x27   : > { %1413 = vmatprep.subr.bf16.mxu1 %v1516_v41 }
  0x28   : > { %644 = vmatmul.mubr.bf16.vlgmr.msra.gmra.mrb[0].mxu0 %v1263_v35 }
  0x29   : > { %685 = vmatmul.mubr.bf16.vlgmr.msra.gmra.mrb[0].mxu1 %v1265_v38  ;;  %1392 = vmatpush3.bf16.msra.mxu0 %v1517_v42 }
  0x2a   : > { %1414 = vmatpush3.bf16.msra.mxu1 %v1518_v43  ;;  %1393 = vmatprep.subr.bf16.mxu0 %v1519_v44 }
  0x2b   : > { %1415 = vmatprep.subr.bf16.mxu1 %v1520_v45  ;;  %937 = vmatprep.mubr.bf16.mxu0 %v1300_v11  ;;  %v1335_v45 = vld [vmem:[%s1890_s2] ss:$0 sm:$0xff] }
  0x2c   : > { %978 = vmatprep.mubr.bf16.mxu1 %v1302_v13 }
  0x2d   : > { %1394 = vmatpush3.bf16.msra.mxu0 %v1521_v46 }
  0x2e   : > { %1416 = vmatpush3.bf16.msra.mxu1 %v1522_v47  ;;  %1395 = vmatprep.subr.bf16.mxu0 %v1523_v48 }
  0x2f   : > { %1417 = vmatprep.subr.bf16.mxu1 %v1524_v49  ;;  %v1336_v49 = vld [vmem:[%s1890_s2 + $0x1] ss:$0 sm:$0xff] }
  0x31   : > { %1396 = vmatpush3.bf16.msra.mxu0 %v1525_v50 }
  0x32   : > { %1418 = vmatpush3.bf16.msra.mxu1 %v1526_v51  ;;  %1397 = vmatprep.subr.bf16.mxu0 %v1527_v52 }
  0x33   : > { %1419 = vmatprep.subr.bf16.mxu1 %v1528_v53 }
  0x35   : > { %1398 = vmatpush3.bf16.msra.mxu0 %v1529_v54 }
  0x36   : > { %1420 = vmatpush3.bf16.msra.mxu1 %v1530_v55  ;;  %1399 = vmatprep.subr.bf16.mxu0 %v1531_v56 }
  0x37   : > { %1421 = vmatprep.subr.bf16.mxu1 %v1532_v57 }
  0x39   : > { %1400 = vmatpush3.bf16.msra.mxu0 %v1533_v58  ;;  %v1342_v58 = vld [vmem:[%s1892_s4] ss:$0 sm:$0xff] }
  0x3a   : > { %1422 = vmatpush3.bf16.msra.mxu1 %v1534_v59  ;;  %1401 = vmatprep.subr.bf16.mxu0 %v1535_v60  ;;  %v1343_v60 = vld [vmem:[%s1892_s4 + $0x1] ss:$0 sm:$0xff] }
  0x3b   : > { %1423 = vmatprep.subr.bf16.mxu1 %v1536_v61 }
  0x3d   : > { %1402 = vmatpush3.bf16.msra.mxu0 %v1537_v62 }
  0x3e   : > { %1424 = vmatpush3.bf16.msra.mxu1 %v1538_v63  ;;  %1403 = vmatprep.subr.bf16.mxu0 %v1539_v0 }
  0x3f   : > { %1425 = vmatprep.subr.bf16.mxu1 %v1540_v1 }
  0x41   : > { %1404 = vmatpush3.bf16.msra.mxu0 %v1541_v2 }
  0x42   : > { %1426 = vmatpush3.bf16.msra.mxu1 %v1542_v3  ;;  %1405 = vmatprep.subr.bf16.mxu0 %v1543_v4 }
  0x43   : > { %1427 = vmatprep.subr.bf16.mxu1 %v1544_v5 }
  0x45   : > { %1406 = vmatpush3.bf16.msra.mxu0 %v1545_v6 }
  0x46   : > { %1428 = vmatpush3.bf16.msra.mxu1 %v1546_v7  ;;  %1440 = vmatprep.subr.bf16.mxu0 %v1579_v15 }
  0x48   : > { %938 = vmatmul.mubr.bf16.vlgmr.msra.gmra.mrb[4].mxu0 %v1299_v10 }
  0x49   : > { %979 = vmatmul.mubr.bf16.vlgmr.msra.gmra.mrb[4].mxu1 %v1301_v12  ;;  %1441 = vmatpush3.bf16.msra.mxu0 %v1551_v14 }
  0x4a   : > { %1442 = vmatprep.subr.bf16.mxu0 %v1579_v15  ;;  %1448 = vmatprep.mubr.msk.bf16.mxu0 %vm1580_vm0, %v1579_v15 }
  0x4d   : > { %1443 = vmatpush3.bf16.msra.mxu0 %v1552_v16 }
  0x4e   : > { %1444 = vmatprep.subr.bf16.mxu0 %v1579_v15 }
  0x51   : > { %1445 = vmatpush3.bf16.msra.mxu0 %v1553_v17 }
  0x52   : > { %1446 = vmatprep.subr.bf16.mxu0 %v1579_v15 }
  0x55   : > { %1447 = vmatpush3.bf16.msra.mxu0 %v1554_v18 }
  0xfb   : > { %v1363_v19 = vpop.f32.mrb[0].mxu0 }
  0xfc   : > { %v1385_v20 = vpop.f32.mrb[0].mxu1  ;;  %v1364_v21 = vpop.f32.mrb[1].mxu0 }
  0xfd   : > { %v1365_v22 = vadd.f32 %v1364_v21, %v1363_v19  ;;  %v1386_v23 = vpop.f32.mrb[1].mxu1  ;;  %v1366_v24 = vpop.f32.mrb[2].mxu0 }
  0xfe   : > { %v1387_v25 = vadd.f32 %v1386_v23, %v1385_v20  ;;  %v1388_v26 = vpop.f32.mrb[2].mxu1  ;;  %v1367_v27 = vpop.f32.mrb[3].mxu0 }
  0xff   : > { %v1368_v28 = vadd.f32 %v1367_v27, %v1366_v24  ;;  %v1389_v29 = vpop.f32.mrb[3].mxu1 }
 0x100   : > { %v687_v30 = vadd.f32 %v1387_v25, %v1365_v22  ;;  %v1390_v31 = vadd.f32 %v1389_v29, %v1388_v26 }
 0x102   : > { %v690_v32 = vadd.f32 %v1390_v31, %v1368_v28 }
 0x11b   : > { %v1407_v33 = vpop.f32.mrb[4].mxu0 }
 0x11c   : > { %v1429_v34 = vpop.f32.mrb[4].mxu1  ;;  %v1408_v35 = vpop.f32.mrb[5].mxu0 }
 0x11d   : > { %v1409_v36 = vadd.f32 %v1408_v35, %v1407_v33  ;;  %v1430_v37 = vpop.f32.mrb[5].mxu1  ;;  %v1410_v38 = vpop.f32.mrb[6].mxu0 }
 0x11e   : > { %v1431_v39 = vadd.f32 %v1430_v37, %v1429_v34  ;;  %v1432_v40 = vpop.f32.mrb[6].mxu1  ;;  %v1411_v41 = vpop.f32.mrb[7].mxu0 }
 0x11f   : > { %v940_v42 = vadd.f32 %v1409_v36, %v687_v30  ;;  %v1412_v43 = vadd.f32 %v1411_v41, %v1410_v38  ;;  %v1433_v44 = vpop.f32.mrb[7].mxu1 }
 0x120   : > { %v1434_v46 = vadd.f32 %v1433_v44, %v1432_v40 }
 0x121   : > { %v981_v47 = vadd.f32 %v1431_v39, %v940_v42  ;;  %v943_v48 = vadd.f32 %v1412_v43, %v690_v32 }
 0x123   : > { %v992_v50 = vmul.f32 %v1335_v45, %v981_v47  ;;  %v984_v51 = vadd.f32 %v1434_v46, %v943_v48 }
 0x125   : > { %v999_v52 = vadd.f32 %v1336_v49, %v992_v50  ;;  %v993_v53 = vmul.f32 %v1335_v45, %v984_v51 }
 0x127   : > { %v1000_v54 = vadd.f32 %v1336_v49, %v993_v53  ;;  %v1001_v55 = vmax.f32 %v999_v52, 0.0 }
 0x129   : > { %v1002_v56 = vmax.f32 %v1000_v54, 0.0 }
 0x12b   : > { %v1003_v57 = vpack.c.bf16 %v1002_v56, %v1001_v55 }
 0x12d   : > { %1449 = vmatmul.mubr.msk.bf16.vlgmr.msra.gmra.mrb[8].mxu0 %vm1036_vm1, %v1003_v57 }
 0x200   : > { %v1074_v59 = vpop.f32.mrb[8].mxu0 }
 0x201   : > { %v1086_v61 = vmul.f32 %v1342_v58, %v1074_v59  ;;  %v1450_v62 = vpop.f32.mrb[9].mxu0 }
 0x202   : > { %v1077_v63 = vpop.f32.mrb[10].mxu0 }
 0x203   : > { %v1093_v0 = vadd.f32 %v1343_v60, %v1086_v61  ;;  %v1087_v1 = vmul.f32 %v1342_v58, %v1077_v63  ;;  %v1451_v2 = vpop.f32.mrb[11].mxu0 }
 0x205   : > { %v1095_v3 = vmax.f32 %v1093_v0, 0.0  ;;  %v1094_v4 = vadd.f32 %v1343_v60, %v1087_v1 }
 0x207   : > { %1097 = vst [vmem:[%s260_s29] sm:$0xff] %v1095_v3  ;;  %v1096_v5 = vmax.f32 %v1094_v4, 0.0 }
 0x209   : > { %1098 = vst [vmem:[%s260_s29 + $0x8] sm:$0xff] %v1096_v5 }
 0x20a PF: > { %s15_s20 = sadd.s32 1, %s1577_s20   ;;  %s1894_s18 = smov %s1573_s19 }
 0x20b   : > { %p12_p5 = scmp.ge.s32.totalorder %s15_s20, 4   ;;  %s1895_s19 = smov %s1897_s21 }
 0x20d   :  { %14 = sbr.rel (!%p12_p5) target bundleno = 2 (0x2), region = 71 }

</bundles_post_ra>
